<compile_context>
chip_gen: v6e
topology: v6e:2x2x1
jax: 0.10.0
libtpu: 0.0.40
codegen_flags: <defaults>
</compile_context>

<pallas_src>
import numpy as np
import jax
import jax.numpy as jnp
from jax import lax
from jax.experimental import pallas as pl
from jax.experimental.pallas import tpu as pltpu


# --------------------------------------------------------------------------
# Kernels
# --------------------------------------------------------------------------
def make_fused_kernel(compute_dtype):
    """Small-graph path: densify A_hat + (A @ X) @ W_masked in one kernel."""

    def fused_kernel(col_ref, val_ref, x_ref, w_ref, out_ref):
        n, max_deg = col_ref.shape
        # Densify A_hat from padded ELL. Padded slots have val == 0 and
        # contribute nothing. Compare/select in int32/f32 (portable to v5e).
        node_ids = lax.broadcasted_iota(jnp.int32, (n, n), 1)
        a = jnp.zeros((n, n), jnp.float32)
        for k in range(max_deg):               # static, short, unrolled
            col_k = col_ref[:, k:k + 1]        # (n, 1) int32
            val_k = val_ref[:, k:k + 1]        # (n, 1) f32
            a = a + jnp.where(node_ids == col_k, val_k, 0.0)

        # Aggregate in the narrow f_pad dim first, then project to f_out.
        ax = jnp.dot(a.astype(compute_dtype), x_ref[...],
                     preferred_element_type=jnp.float32)
        out_ref[...] = jnp.dot(ax.astype(compute_dtype), w_ref[...],
                               preferred_element_type=jnp.float32)

    return fused_kernel


def make_aggregate_kernel(block_k: int, compute_dtype):
    """Large-graph phase 1: AX[block_n] += A_hat[block_n, k-tile] @ X[k-tile]."""

    def aggregate_kernel(col_ref, val_ref, x_ref, ax_ref, acc_ref):
        j = pl.program_id(1)

        @pl.when(j == 0)
        def _():
            acc_ref[...] = jnp.zeros_like(acc_ref)

        block_n, max_deg = col_ref.shape
        # Densify only the columns covered by this K tile.
        base = j * block_k
        node_ids = base + lax.broadcasted_iota(jnp.int32, (block_n, block_k), 1)
        a_tile = jnp.zeros((block_n, block_k), jnp.float32)
        for k in range(max_deg):               # static, short, unrolled
            col_k = col_ref[:, k:k + 1]        # (block_n, 1) int32
            val_k = val_ref[:, k:k + 1]        # (block_n, 1) f32
            a_tile = a_tile + jnp.where(node_ids == col_k, val_k, 0.0)

        acc_ref[...] += jnp.dot(a_tile.astype(compute_dtype), x_ref[...],
                                preferred_element_type=jnp.float32)

        @pl.when(j == pl.num_programs(1) - 1)
        def _():
            ax_ref[...] = acc_ref[...].astype(ax_ref.dtype)

    return aggregate_kernel


def project_kernel(ax_ref, w_ref, out_ref):
    """Large-graph phase 2: out_block = AX_block @ W_masked (lane-dense store)."""
    out_ref[...] = jnp.dot(ax_ref[...], w_ref[...],
                           preferred_element_type=jnp.float32
                           ).astype(out_ref.dtype)


# --------------------------------------------------------------------------
# Host-side graph preprocessing: CSR -> padded ELL (one-time, static structure)
# --------------------------------------------------------------------------
def csr_to_ell(row_ptr, col_idx, values, pad_multiple=8):
    row_ptr = np.asarray(row_ptr)
    col_idx = np.asarray(col_idx)
    values = np.asarray(values)
    n = row_ptr.shape[0] - 1
    deg = np.diff(row_ptr)
    max_deg = int(deg.max()) if n > 0 else 0
    max_deg = max(pad_multiple,
                  int(np.ceil(max_deg / pad_multiple)) * pad_multiple)
    col_ell = np.zeros((n, max_deg), dtype=np.int32)
    val_ell = np.zeros((n, max_deg), dtype=np.float32)   # padded slots: val==0
    for i in range(n):
        s, e = int(row_ptr[i]), int(row_ptr[i + 1])
        col_ell[i, :e - s] = col_idx[s:e]
        val_ell[i, :e - s] = values[s:e]
    return jnp.asarray(col_ell), jnp.asarray(val_ell)


# --------------------------------------------------------------------------
# Wrapper mirroring GCNLayer.forward
# --------------------------------------------------------------------------
def gcn_layer_forward(row_ptr, col_idx, values, X, W, actual_f, *,
                      block_n=256, block_k=256,
                      compute_dtype=jnp.bfloat16,
                      fuse_threshold_nodes=1024):
    n_nodes, f_pad = X.shape
    f_out = W.shape[1]

    # One-time graph-structure preprocessing (host side, static structure).
    col_ell, val_ell = csr_to_ell(row_ptr, col_idx, values)
    max_deg = col_ell.shape[1]

    # Hoist the actual_F mask: zero W rows >= actual_f ONCE in the wrapper.
    # (A @ X) @ mask(W) == A @ (X[:, :actual_f] @ W[:actual_f, :]).
    row_ids = jnp.arange(f_pad, dtype=jnp.int32)[:, None]
    w_masked = jnp.where(row_ids < actual_f, W, jnp.zeros_like(W))

    x_c = X.astype(compute_dtype)
    w_c = w_masked.astype(compute_dtype)

    vmem_limit = 48 * 1024 * 1024   # stays inside v7x's 64 MiB physical VMEM

    # ---- Small-graph path: one fused gridless kernel, AX stays in VMEM ----
    if n_nodes <= fuse_threshold_nodes:
        return pl.pallas_call(
            make_fused_kernel(compute_dtype),
            out_shape=jax.ShapeDtypeStruct((n_nodes, f_out), jnp.float32),
            compiler_params=pltpu.CompilerParams(vmem_limit_bytes=vmem_limit),
        )(col_ell, val_ell, x_c, w_c)

    # ---- Large-graph path: K-tiled aggregation, then dense projection ----
    bn = min(block_n, n_nodes)
    bk = min(block_k, n_nodes)
    assert n_nodes % bn == 0 and bn % 8 == 0, \
        "node count must be divisible by an 8-aligned row-block size"
    assert n_nodes % bk == 0 and bk % 8 == 0, \
        "node count must be divisible by an 8-aligned column-tile size"

    # Phase 1: AX = A_hat @ X. Row-block axis "parallel" (megacore),
    # node-column K axis "arbitrary" with pl.when-init/finalize accumulator.
    ax = pl.pallas_call(
        make_aggregate_kernel(bk, compute_dtype),
        out_shape=jax.ShapeDtypeStruct((n_nodes, f_pad), compute_dtype),
        grid=(n_nodes // bn, n_nodes // bk),
        in_specs=[
            pl.BlockSpec((bn, max_deg), lambda i, j: (i, 0)),   # ELL cols
            pl.BlockSpec((bn, max_deg), lambda i, j: (i, 0)),   # ELL vals
            pl.BlockSpec((bk, f_pad), lambda i, j: (j, 0)),     # X column tile
        ],
        out_specs=pl.BlockSpec((bn, f_pad), lambda i, j: (i, 0)),
        scratch_shapes=[pltpu.VMEM((bn, f_pad), jnp.float32)],
        compiler_params=pltpu.CompilerParams(
            dimension_semantics=("parallel", "arbitrary"),
            vmem_limit_bytes=vmem_limit),
    )(col_ell, val_ell, x_c)

    # Phase 2: out = AX @ W_masked (MXU, lane-dense f_out stores).
    out = pl.pallas_call(
        project_kernel,
        out_shape=jax.ShapeDtypeStruct((n_nodes, f_out), jnp.float32),
        grid=(n_nodes // bn,),
        in_specs=[
            pl.BlockSpec((bn, f_pad), lambda i: (i, 0)),
            pl.BlockSpec((f_pad, f_out), lambda i: (0, 0)),
        ],
        out_specs=pl.BlockSpec((bn, f_out), lambda i: (i, 0)),
        compiler_params=pltpu.CompilerParams(
            dimension_semantics=("parallel",),
            vmem_limit_bytes=vmem_limit),
    )(ax, w_c)

    return out


# --------------------------------------------------------------------------
# Demo graph construction (normalized A_hat in CSR, like the PyG setup)
# --------------------------------------------------------------------------
def build_graph_csr(n_nodes, rng):
    adj = np.zeros((n_nodes, n_nodes), dtype=np.float32)
    idx = np.arange(n_nodes)
    adj[idx, (idx + 1) % n_nodes] = 1.0           # ring: degree >= 2 everywhere
    adj[(idx + 1) % n_nodes, idx] = 1.0
    extra = rng.integers(0, n_nodes, size=(2, 3 * n_nodes))
    for s, d in zip(extra[0], extra[1]):
        if s != d:
            adj[s, d] = 1.0
            adj[d, s] = 1.0

    deg = adj.sum(axis=1)
    d_inv_sqrt = 1.0 / np.sqrt(deg)
    a_hat = adj * d_inv_sqrt[:, None] * d_inv_sqrt[None, :]

    row_ptr = [0]
    col_idx = []
    values = []
    for i in range(n_nodes):
        cols = np.nonzero(adj[i])[0]
        col_idx.extend(cols.tolist())
        values.extend(a_hat[i, cols].tolist())
        row_ptr.append(len(col_idx))

    return (np.asarray(row_ptr, dtype=np.int32),
            np.asarray(col_idx, dtype=np.int32),
            np.asarray(values, dtype=np.float32),
            a_hat.astype(np.float32))


def reference_f64(a_hat_dense, X, W, actual_f):
    a64 = np.asarray(a_hat_dense, dtype=np.float64)
    x64 = np.asarray(X, dtype=np.float64)
    w64 = np.asarray(W, dtype=np.float64)
    return a64 @ (x64[:, :actual_f] @ w64[:actual_f, :])


if __name__ == "__main__":
    F_PAD = 64      # in_features_padded
    ACTUAL_F = 50   # actual_in_features
    F_OUT = 128     # out_features (128 lanes -> lane-dense output stores)

    key = jax.random.PRNGKey(0)
    kx1, kx2, kw = jax.random.split(key, 3)
    # GCNLayer.__init__: W = randn(F_pad, F_out) / sqrt(actual_F)
    scale = 1.0 / np.sqrt(np.float32(ACTUAL_F))
    W = jax.random.normal(kw, (F_PAD, F_OUT), dtype=jnp.float32) * scale

    # ---------------- small graph: fused single-kernel path ----------------
    N_SMALL = 64
    rp, ci, vals, a_dense = build_graph_csr(N_SMALL, np.random.default_rng(0))
    X_small = jax.random.normal(kx1, (N_SMALL, F_PAD), dtype=jnp.float32)
    ref_small = reference_f64(a_dense, X_small, W, ACTUAL_F)

    # f32 compute: exact forward semantics of the original module.
    out_f32 = gcn_layer_forward(jnp.asarray(rp), jnp.asarray(ci),
                                jnp.asarray(vals), X_small, W, ACTUAL_F,
                                compute_dtype=jnp.float32)
    out_f32 = jax.block_until_ready(out_f32)
    np.testing.assert_allclose(np.asarray(out_f32), ref_small,
                               rtol=5e-3, atol=5e-3)

    # bf16 MXU operands, f32 accumulation (relaxed tolerance).
    out_bf16 = gcn_layer_forward(jnp.asarray(rp), jnp.asarray(ci),
                                 jnp.asarray(vals), X_small, W, ACTUAL_F,
                                 compute_dtype=jnp.bfloat16)
    out_bf16 = jax.block_until_ready(out_bf16)
    np.testing.assert_allclose(np.asarray(out_bf16), ref_small,
                               rtol=6e-2, atol=6e-2)

    # ---------------- larger graph: K-tiled two-phase path ----------------
    N_LARGE = 512
    rp2, ci2, vals2, a_dense2 = build_graph_csr(N_LARGE,
                                                np.random.default_rng(1))
    X_large = jax.random.normal(kx2, (N_LARGE, F_PAD), dtype=jnp.float32)
    ref_large = reference_f64(a_dense2, X_large, W, ACTUAL_F)

    out_large = gcn_layer_forward(jnp.asarray(rp2), jnp.asarray(ci2),
                                  jnp.asarray(vals2), X_large, W, ACTUAL_F,
                                  block_n=256, block_k=128,
                                  compute_dtype=jnp.bfloat16,
                                  fuse_threshold_nodes=128)  # force tiled path
    out_large = jax.block_until_ready(out_large)
    np.testing.assert_allclose(np.asarray(out_large), ref_large,
                               rtol=6e-2, atol=6e-2)

    print("KERNEL_OK")
</pallas_src>

<mosaic_0001>
module attributes {stable_mosaic.version = 11 : i64} {
  func.func @fused_kernel(%arg0: memref<64x16xi32, #tpu.memory_space<vmem>>, %arg1: memref<64x16xf32, #tpu.memory_space<vmem>>, %arg2: memref<64x64xf32, #tpu.memory_space<vmem>>, %arg3: memref<64x128xf32, #tpu.memory_space<vmem>>, %arg4: memref<64x128xf32, #tpu.memory_space<vmem>>) attributes {dimension_semantics = [], scalar_prefetch = 0 : i64, scratch_operands = 0 : i64, tpu.core_type = #tpu.core_type<tc>} {
    %0 = tpu.iota {dimensions = array<i32: 1>} : vector<64x64xi32>
    %cst = arith.constant 0.000000e+00 : f32
    %1 = vector.broadcast %cst : f32 to vector<64x64xf32>
    %c0 = arith.constant 0 : index
    %c0_0 = arith.constant 0 : index
    %2 = vector.load %arg0[%c0, %c0_0] : memref<64x16xi32, #tpu.memory_space<vmem>>, vector<64x1xi32>
    %c0_1 = arith.constant 0 : index
    %c0_2 = arith.constant 0 : index
    %3 = vector.load %arg1[%c0_1, %c0_2] : memref<64x16xf32, #tpu.memory_space<vmem>>, vector<64x1xf32>
    %4 = vector.broadcast %2 : vector<64x1xi32> to vector<64x64xi32>
    %5 = arith.cmpi eq, %0, %4 : vector<64x64xi32>
    %cst_3 = arith.constant 0.000000e+00 : f32
    %6 = vector.shape_cast %3 : vector<64x1xf32> to vector<64x1xf32>
    %7 = vector.broadcast %6 : vector<64x1xf32> to vector<64x64xf32>
    %8 = vector.broadcast %cst_3 : f32 to vector<64x64xf32>
    %9 = arith.select %5, %7, %8 : vector<64x64xi1>, vector<64x64xf32>
    %10 = arith.addf %1, %9 : vector<64x64xf32>
    %c0_4 = arith.constant 0 : index
    %c1 = arith.constant 1 : index
    %11 = vector.load %arg0[%c0_4, %c1] : memref<64x16xi32, #tpu.memory_space<vmem>>, vector<64x1xi32>
    %c0_5 = arith.constant 0 : index
    %c1_6 = arith.constant 1 : index
    %12 = vector.load %arg1[%c0_5, %c1_6] : memref<64x16xf32, #tpu.memory_space<vmem>>, vector<64x1xf32>
    %13 = vector.broadcast %11 : vector<64x1xi32> to vector<64x64xi32>
    %14 = arith.cmpi eq, %0, %13 : vector<64x64xi32>
    %cst_7 = arith.constant 0.000000e+00 : f32
    %15 = vector.shape_cast %12 : vector<64x1xf32> to vector<64x1xf32>
    %16 = vector.broadcast %15 : vector<64x1xf32> to vector<64x64xf32>
    %17 = vector.broadcast %cst_7 : f32 to vector<64x64xf32>
    %18 = arith.select %14, %16, %17 : vector<64x64xi1>, vector<64x64xf32>
    %19 = arith.addf %10, %18 : vector<64x64xf32>
    %c0_8 = arith.constant 0 : index
    %c2 = arith.constant 2 : index
    %20 = vector.load %arg0[%c0_8, %c2] : memref<64x16xi32, #tpu.memory_space<vmem>>, vector<64x1xi32>
    %c0_9 = arith.constant 0 : index
    %c2_10 = arith.constant 2 : index
    %21 = vector.load %arg1[%c0_9, %c2_10] : memref<64x16xf32, #tpu.memory_space<vmem>>, vector<64x1xf32>
    %22 = vector.broadcast %20 : vector<64x1xi32> to vector<64x64xi32>
    %23 = arith.cmpi eq, %0, %22 : vector<64x64xi32>
    %cst_11 = arith.constant 0.000000e+00 : f32
    %24 = vector.shape_cast %21 : vector<64x1xf32> to vector<64x1xf32>
    %25 = vector.broadcast %24 : vector<64x1xf32> to vector<64x64xf32>
    %26 = vector.broadcast %cst_11 : f32 to vector<64x64xf32>
    %27 = arith.select %23, %25, %26 : vector<64x64xi1>, vector<64x64xf32>
    %28 = arith.addf %19, %27 : vector<64x64xf32>
    %c0_12 = arith.constant 0 : index
    %c3 = arith.constant 3 : index
    %29 = vector.load %arg0[%c0_12, %c3] : memref<64x16xi32, #tpu.memory_space<vmem>>, vector<64x1xi32>
    %c0_13 = arith.constant 0 : index
    %c3_14 = arith.constant 3 : index
    %30 = vector.load %arg1[%c0_13, %c3_14] : memref<64x16xf32, #tpu.memory_space<vmem>>, vector<64x1xf32>
    %31 = vector.broadcast %29 : vector<64x1xi32> to vector<64x64xi32>
    %32 = arith.cmpi eq, %0, %31 : vector<64x64xi32>
    %cst_15 = arith.constant 0.000000e+00 : f32
    %33 = vector.shape_cast %30 : vector<64x1xf32> to vector<64x1xf32>
    %34 = vector.broadcast %33 : vector<64x1xf32> to vector<64x64xf32>
    %35 = vector.broadcast %cst_15 : f32 to vector<64x64xf32>
    %36 = arith.select %32, %34, %35 : vector<64x64xi1>, vector<64x64xf32>
    %37 = arith.addf %28, %36 : vector<64x64xf32>
    %c0_16 = arith.constant 0 : index
    %c4 = arith.constant 4 : index
    %38 = vector.load %arg0[%c0_16, %c4] : memref<64x16xi32, #tpu.memory_space<vmem>>, vector<64x1xi32>
    %c0_17 = arith.constant 0 : index
    %c4_18 = arith.constant 4 : index
    %39 = vector.load %arg1[%c0_17, %c4_18] : memref<64x16xf32, #tpu.memory_space<vmem>>, vector<64x1xf32>
    %40 = vector.broadcast %38 : vector<64x1xi32> to vector<64x64xi32>
    %41 = arith.cmpi eq, %0, %40 : vector<64x64xi32>
    %cst_19 = arith.constant 0.000000e+00 : f32
    %42 = vector.shape_cast %39 : vector<64x1xf32> to vector<64x1xf32>
    %43 = vector.broadcast %42 : vector<64x1xf32> to vector<64x64xf32>
    %44 = vector.broadcast %cst_19 : f32 to vector<64x64xf32>
    %45 = arith.select %41, %43, %44 : vector<64x64xi1>, vector<64x64xf32>
    %46 = arith.addf %37, %45 : vector<64x64xf32>
    %c0_20 = arith.constant 0 : index
    %c5 = arith.constant 5 : index
    %47 = vector.load %arg0[%c0_20, %c5] : memref<64x16xi32, #tpu.memory_space<vmem>>, vector<64x1xi32>
    %c0_21 = arith.constant 0 : index
    %c5_22 = arith.constant 5 : index
    %48 = vector.load %arg1[%c0_21, %c5_22] : memref<64x16xf32, #tpu.memory_space<vmem>>, vector<64x1xf32>
    %49 = vector.broadcast %47 : vector<64x1xi32> to vector<64x64xi32>
    %50 = arith.cmpi eq, %0, %49 : vector<64x64xi32>
    %cst_23 = arith.constant 0.000000e+00 : f32
    %51 = vector.shape_cast %48 : vector<64x1xf32> to vector<64x1xf32>
    %52 = vector.broadcast %51 : vector<64x1xf32> to vector<64x64xf32>
    %53 = vector.broadcast %cst_23 : f32 to vector<64x64xf32>
    %54 = arith.select %50, %52, %53 : vector<64x64xi1>, vector<64x64xf32>
    %55 = arith.addf %46, %54 : vector<64x64xf32>
    %c0_24 = arith.constant 0 : index
    %c6 = arith.constant 6 : index
    %56 = vector.load %arg0[%c0_24, %c6] : memref<64x16xi32, #tpu.memory_space<vmem>>, vector<64x1xi32>
    %c0_25 = arith.constant 0 : index
    %c6_26 = arith.constant 6 : index
    %57 = vector.load %arg1[%c0_25, %c6_26] : memref<64x16xf32, #tpu.memory_space<vmem>>, vector<64x1xf32>
    %58 = vector.broadcast %56 : vector<64x1xi32> to vector<64x64xi32>
    %59 = arith.cmpi eq, %0, %58 : vector<64x64xi32>
    %cst_27 = arith.constant 0.000000e+00 : f32
    %60 = vector.shape_cast %57 : vector<64x1xf32> to vector<64x1xf32>
    %61 = vector.broadcast %60 : vector<64x1xf32> to vector<64x64xf32>
    %62 = vector.broadcast %cst_27 : f32 to vector<64x64xf32>
    %63 = arith.select %59, %61, %62 : vector<64x64xi1>, vector<64x64xf32>
    %64 = arith.addf %55, %63 : vector<64x64xf32>
    %c0_28 = arith.constant 0 : index
    %c7 = arith.constant 7 : index
    %65 = vector.load %arg0[%c0_28, %c7] : memref<64x16xi32, #tpu.memory_space<vmem>>, vector<64x1xi32>
    %c0_29 = arith.constant 0 : index
    %c7_30 = arith.constant 7 : index
    %66 = vector.load %arg1[%c0_29, %c7_30] : memref<64x16xf32, #tpu.memory_space<vmem>>, vector<64x1xf32>
    %67 = vector.broadcast %65 : vector<64x1xi32> to vector<64x64xi32>
    %68 = arith.cmpi eq, %0, %67 : vector<64x64xi32>
    %cst_31 = arith.constant 0.000000e+00 : f32
    %69 = vector.shape_cast %66 : vector<64x1xf32> to vector<64x1xf32>
    %70 = vector.broadcast %69 : vector<64x1xf32> to vector<64x64xf32>
    %71 = vector.broadcast %cst_31 : f32 to vector<64x64xf32>
    %72 = arith.select %68, %70, %71 : vector<64x64xi1>, vector<64x64xf32>
    %73 = arith.addf %64, %72 : vector<64x64xf32>
    %c0_32 = arith.constant 0 : index
    %c8 = arith.constant 8 : index
    %74 = vector.load %arg0[%c0_32, %c8] : memref<64x16xi32, #tpu.memory_space<vmem>>, vector<64x1xi32>
    %c0_33 = arith.constant 0 : index
    %c8_34 = arith.constant 8 : index
    %75 = vector.load %arg1[%c0_33, %c8_34] : memref<64x16xf32, #tpu.memory_space<vmem>>, vector<64x1xf32>
    %76 = vector.broadcast %74 : vector<64x1xi32> to vector<64x64xi32>
    %77 = arith.cmpi eq, %0, %76 : vector<64x64xi32>
    %cst_35 = arith.constant 0.000000e+00 : f32
    %78 = vector.shape_cast %75 : vector<64x1xf32> to vector<64x1xf32>
    %79 = vector.broadcast %78 : vector<64x1xf32> to vector<64x64xf32>
    %80 = vector.broadcast %cst_35 : f32 to vector<64x64xf32>
    %81 = arith.select %77, %79, %80 : vector<64x64xi1>, vector<64x64xf32>
    %82 = arith.addf %73, %81 : vector<64x64xf32>
    %c0_36 = arith.constant 0 : index
    %c9 = arith.constant 9 : index
    %83 = vector.load %arg0[%c0_36, %c9] : memref<64x16xi32, #tpu.memory_space<vmem>>, vector<64x1xi32>
    %c0_37 = arith.constant 0 : index
    %c9_38 = arith.constant 9 : index
    %84 = vector.load %arg1[%c0_37, %c9_38] : memref<64x16xf32, #tpu.memory_space<vmem>>, vector<64x1xf32>
    %85 = vector.broadcast %83 : vector<64x1xi32> to vector<64x64xi32>
    %86 = arith.cmpi eq, %0, %85 : vector<64x64xi32>
    %cst_39 = arith.constant 0.000000e+00 : f32
    %87 = vector.shape_cast %84 : vector<64x1xf32> to vector<64x1xf32>
    %88 = vector.broadcast %87 : vector<64x1xf32> to vector<64x64xf32>
    %89 = vector.broadcast %cst_39 : f32 to vector<64x64xf32>
    %90 = arith.select %86, %88, %89 : vector<64x64xi1>, vector<64x64xf32>
    %91 = arith.addf %82, %90 : vector<64x64xf32>
    %c0_40 = arith.constant 0 : index
    %c10 = arith.constant 10 : index
    %92 = vector.load %arg0[%c0_40, %c10] : memref<64x16xi32, #tpu.memory_space<vmem>>, vector<64x1xi32>
    %c0_41 = arith.constant 0 : index
    %c10_42 = arith.constant 10 : index
    %93 = vector.load %arg1[%c0_41, %c10_42] : memref<64x16xf32, #tpu.memory_space<vmem>>, vector<64x1xf32>
    %94 = vector.broadcast %92 : vector<64x1xi32> to vector<64x64xi32>
    %95 = arith.cmpi eq, %0, %94 : vector<64x64xi32>
    %cst_43 = arith.constant 0.000000e+00 : f32
    %96 = vector.shape_cast %93 : vector<64x1xf32> to vector<64x1xf32>
    %97 = vector.broadcast %96 : vector<64x1xf32> to vector<64x64xf32>
    %98 = vector.broadcast %cst_43 : f32 to vector<64x64xf32>
    %99 = arith.select %95, %97, %98 : vector<64x64xi1>, vector<64x64xf32>
    %100 = arith.addf %91, %99 : vector<64x64xf32>
    %c0_44 = arith.constant 0 : index
    %c11 = arith.constant 11 : index
    %101 = vector.load %arg0[%c0_44, %c11] : memref<64x16xi32, #tpu.memory_space<vmem>>, vector<64x1xi32>
    %c0_45 = arith.constant 0 : index
    %c11_46 = arith.constant 11 : index
    %102 = vector.load %arg1[%c0_45, %c11_46] : memref<64x16xf32, #tpu.memory_space<vmem>>, vector<64x1xf32>
    %103 = vector.broadcast %101 : vector<64x1xi32> to vector<64x64xi32>
    %104 = arith.cmpi eq, %0, %103 : vector<64x64xi32>
    %cst_47 = arith.constant 0.000000e+00 : f32
    %105 = vector.shape_cast %102 : vector<64x1xf32> to vector<64x1xf32>
    %106 = vector.broadcast %105 : vector<64x1xf32> to vector<64x64xf32>
    %107 = vector.broadcast %cst_47 : f32 to vector<64x64xf32>
    %108 = arith.select %104, %106, %107 : vector<64x64xi1>, vector<64x64xf32>
    %109 = arith.addf %100, %108 : vector<64x64xf32>
    %c0_48 = arith.constant 0 : index
    %c12 = arith.constant 12 : index
    %110 = vector.load %arg0[%c0_48, %c12] : memref<64x16xi32, #tpu.memory_space<vmem>>, vector<64x1xi32>
    %c0_49 = arith.constant 0 : index
    %c12_50 = arith.constant 12 : index
    %111 = vector.load %arg1[%c0_49, %c12_50] : memref<64x16xf32, #tpu.memory_space<vmem>>, vector<64x1xf32>
    %112 = vector.broadcast %110 : vector<64x1xi32> to vector<64x64xi32>
    %113 = arith.cmpi eq, %0, %112 : vector<64x64xi32>
    %cst_51 = arith.constant 0.000000e+00 : f32
    %114 = vector.shape_cast %111 : vector<64x1xf32> to vector<64x1xf32>
    %115 = vector.broadcast %114 : vector<64x1xf32> to vector<64x64xf32>
    %116 = vector.broadcast %cst_51 : f32 to vector<64x64xf32>
    %117 = arith.select %113, %115, %116 : vector<64x64xi1>, vector<64x64xf32>
    %118 = arith.addf %109, %117 : vector<64x64xf32>
    %c0_52 = arith.constant 0 : index
    %c13 = arith.constant 13 : index
    %119 = vector.load %arg0[%c0_52, %c13] : memref<64x16xi32, #tpu.memory_space<vmem>>, vector<64x1xi32>
    %c0_53 = arith.constant 0 : index
    %c13_54 = arith.constant 13 : index
    %120 = vector.load %arg1[%c0_53, %c13_54] : memref<64x16xf32, #tpu.memory_space<vmem>>, vector<64x1xf32>
    %121 = vector.broadcast %119 : vector<64x1xi32> to vector<64x64xi32>
    %122 = arith.cmpi eq, %0, %121 : vector<64x64xi32>
    %cst_55 = arith.constant 0.000000e+00 : f32
    %123 = vector.shape_cast %120 : vector<64x1xf32> to vector<64x1xf32>
    %124 = vector.broadcast %123 : vector<64x1xf32> to vector<64x64xf32>
    %125 = vector.broadcast %cst_55 : f32 to vector<64x64xf32>
    %126 = arith.select %122, %124, %125 : vector<64x64xi1>, vector<64x64xf32>
    %127 = arith.addf %118, %126 : vector<64x64xf32>
    %c0_56 = arith.constant 0 : index
    %c14 = arith.constant 14 : index
    %128 = vector.load %arg0[%c0_56, %c14] : memref<64x16xi32, #tpu.memory_space<vmem>>, vector<64x1xi32>
    %c0_57 = arith.constant 0 : index
    %c14_58 = arith.constant 14 : index
    %129 = vector.load %arg1[%c0_57, %c14_58] : memref<64x16xf32, #tpu.memory_space<vmem>>, vector<64x1xf32>
    %130 = vector.broadcast %128 : vector<64x1xi32> to vector<64x64xi32>
    %131 = arith.cmpi eq, %0, %130 : vector<64x64xi32>
    %cst_59 = arith.constant 0.000000e+00 : f32
    %132 = vector.shape_cast %129 : vector<64x1xf32> to vector<64x1xf32>
    %133 = vector.broadcast %132 : vector<64x1xf32> to vector<64x64xf32>
    %134 = vector.broadcast %cst_59 : f32 to vector<64x64xf32>
    %135 = arith.select %131, %133, %134 : vector<64x64xi1>, vector<64x64xf32>
    %136 = arith.addf %127, %135 : vector<64x64xf32>
    %c0_60 = arith.constant 0 : index
    %c15 = arith.constant 15 : index
    %137 = vector.load %arg0[%c0_60, %c15] : memref<64x16xi32, #tpu.memory_space<vmem>>, vector<64x1xi32>
    %c0_61 = arith.constant 0 : index
    %c15_62 = arith.constant 15 : index
    %138 = vector.load %arg1[%c0_61, %c15_62] : memref<64x16xf32, #tpu.memory_space<vmem>>, vector<64x1xf32>
    %139 = vector.broadcast %137 : vector<64x1xi32> to vector<64x64xi32>
    %140 = arith.cmpi eq, %0, %139 : vector<64x64xi32>
    %cst_63 = arith.constant 0.000000e+00 : f32
    %141 = vector.shape_cast %138 : vector<64x1xf32> to vector<64x1xf32>
    %142 = vector.broadcast %141 : vector<64x1xf32> to vector<64x64xf32>
    %143 = vector.broadcast %cst_63 : f32 to vector<64x64xf32>
    %144 = arith.select %140, %142, %143 : vector<64x64xi1>, vector<64x64xf32>
    %145 = arith.addf %136, %144 : vector<64x64xf32>
    %c0_64 = arith.constant 0 : index
    %c0_65 = arith.constant 0 : index
    %146 = vector.load %arg2[%c0_64, %c0_65] : memref<64x64xf32, #tpu.memory_space<vmem>>, vector<64x64xf32>
    %cst_66 = arith.constant dense<0.000000e+00> : vector<64x64xf32>
    %147 = tpu.matmul %145, %146, %cst_66 {dimension_numbers = #tpu.dot_dimension_numbers<[1], [0], [0], [1], [0, 0, 1, 1], [], []>} : vector<64x64xf32>, vector<64x64xf32>, vector<64x64xf32> -> vector<64x64xf32>
    %c0_67 = arith.constant 0 : index
    %c0_68 = arith.constant 0 : index
    %148 = vector.load %arg3[%c0_67, %c0_68] : memref<64x128xf32, #tpu.memory_space<vmem>>, vector<64x128xf32>
    %cst_69 = arith.constant dense<0.000000e+00> : vector<64x128xf32>
    %149 = tpu.matmul %147, %148, %cst_69 {dimension_numbers = #tpu.dot_dimension_numbers<[1], [0], [0], [1], [0, 0, 1, 1], [], []>} : vector<64x64xf32>, vector<64x128xf32>, vector<64x128xf32> -> vector<64x128xf32>
    %c0_70 = arith.constant 0 : index
    %c0_71 = arith.constant 0 : index
    %150 = vector.load %arg4[%c0_70, %c0_71] : memref<64x128xf32, #tpu.memory_space<vmem>>, vector<64x128xf32>
    tpu.vector_store %arg4[%c0_70, %c0_71], %149 {strides = array<i32>} : memref<64x128xf32, #tpu.memory_space<vmem>>, vector<64x128xf32>,
    return
  }
}

</mosaic_0001>

<bundles_post_ra>
// kernel: tpu_custom_call.1
= control target key start
LH: loop header
LB: loop body
LE: loop exit
PB: predicated region body
PF: predicated region fallthrough
CT: control target
= control target key end

     0   :  { %v1874_v2 = vmov 0   ;;  %s3174_s0 = inlined_call_operand.vmem [shape: s32[64,16], index: 0, kind: input, shape index: {}]   ;;  %s3175_s1 = inlined_call_operand.vmem [shape: f32[64,16], index: 1, kind: input, shape index: {}]   ;;  %s3176_s2 = inlined_call_operand.vmem [shape: f32[64,64], index: 2, kind: input, shape index: {}]   ;;  %s3177_s3 = inlined_call_operand.vmem [shape: f32[64,128], index: 3, kind: input, shape index: {}]   ;;  %s3178_s4 = inlined_call_operand.hbm [shape: f32[64,128], index: 4, kind: output, shape index: {}]  }
   0x1   :  { %v1921_v0 = vld [vmem:[%s3174_s0 + $0x10] sm:$0xff]  ;;  %v1926_v1 = vld [vmem:[%s3174_s0] sm:$0xff]  ;;  %1747 = vset.pattern.permute.xlu1 %v1874_v2  ;;  %1746 = vset.pattern.permute.xlu0 %v1874_v2  ;;  %v1933_v3 = vld [vmem:[%s3174_s0 + $0x18] sm:$0xff] }
   0x2   :  { %43 = vperm.xlu1 %1747, %v1921_v0   ;;  %37 = vperm.xlu0 %1746, %v1926_v1   ;;  %v1938_v4 = vld [vmem:[%s3174_s0 + $0x8] sm:$0xff] }
   0x3   :  { %9 = vsyncpa [#allocation3], 0  ;;  %v1945_v5 = vld [vmem:[%s3174_s0 + $0x28] sm:$0xff]  ;;  %v1950_v6 = vld [vmem:[%s3174_s0 + $0x20] sm:$0xff]  ;;  %v1875_v17 = vmov 1   ;;  %v1876_v18 = vmov 2  }
   0x4   :  { %v1957_v7 = vld [vmem:[%s3174_s0 + $0x38] sm:$0xff]  ;;  %v1962_v8 = vld [vmem:[%s3174_s0 + $0x30] sm:$0xff]  ;;  %v1969_v9 = vld [vmem:[%s3175_s1 + $0x8] sm:$0xff]  ;;  %v1877_v19 = vmov 3   ;;  %v1878_v23 = vmov 4   ;;  %v1879_v38 = vmov 5  }
   0x5   :  { %v1974_v10 = vld [vmem:[%s3175_s1] sm:$0xff]  ;;  %v1981_v11 = vld [vmem:[%s3175_s1 + $0x18] sm:$0xff]  ;;  %v1986_v12 = vld [vmem:[%s3175_s1 + $0x10] sm:$0xff]  ;;  %v1880_v55 = vmov 6  }
   0x6   :  { %46 = vperm.xlu1 %1747, %v1933_v3   ;;  %40 = vperm.xlu0 %1746, %v1938_v4   ;;  %v1993_v13 = vld [vmem:[%s3175_s1 + $0x28] sm:$0xff]  ;;  %v1998_v14 = vld [vmem:[%s3175_s1 + $0x20] sm:$0xff]  ;;  %v2005_v15 = vld [vmem:[%s3175_s1 + $0x38] sm:$0xff] }
   0x7   :  { %v2010_v16 = vld [vmem:[%s3175_s1 + $0x30] sm:$0xff] }
   0xa   :  { %52 = vperm.xlu1 %1747, %v1945_v5   ;;  %49 = vperm.xlu0 %1746, %v1950_v6  }
   0xe   :  { %58 = vperm.xlu1 %1747, %v1957_v7   ;;  %55 = vperm.xlu0 %1746, %v1962_v8  }
  0x12   :  { %75 = vperm.xlu1 %1747, %v1969_v9   ;;  %70 = vperm.xlu0 %1746, %v1974_v10  }
  0x16   :  { %85 = vperm.xlu1 %1747, %v1981_v11   ;;  %80 = vperm.xlu0 %1746, %v1986_v12  }
  0x1a   :  { %95 = vperm.xlu1 %1747, %v1993_v13   ;;  %90 = vperm.xlu0 %1746, %v1998_v14  }
  0x1e   :  { %105 = vperm.xlu1 %1747, %v2005_v15   ;;  %100 = vperm.xlu0 %1746, %v2010_v16  }
  0x22   :  { %1749 = vset.pattern.permute.xlu1 %v1875_v17  ;;  %1748 = vset.pattern.permute.xlu0 %v1875_v17 }
  0x23   :  { %128 = vperm.xlu1 %1749, %v1938_v4   ;;  %125 = vperm.xlu0 %1748, %v1926_v1  }
  0x27   :  { %131 = vperm.xlu1 %1749, %v1921_v0   ;;  %134 = vperm.xlu0 %1748, %v1933_v3  }
  0x2b   :  { %137 = vperm.xlu1 %1749, %v1950_v6   ;;  %140 = vperm.xlu0 %1748, %v1945_v5  }
  0x2f   :  { %143 = vperm.xlu1 %1749, %v1962_v8   ;;  %146 = vperm.xlu0 %1748, %v1957_v7  }
  0x33   :  { %157 = vperm.xlu1 %1749, %v1974_v10   ;;  %161 = vperm.xlu0 %1748, %v1969_v9  }
  0x37   :  { %165 = vperm.xlu1 %1749, %v1986_v12   ;;  %169 = vperm.xlu0 %1748, %v1981_v11  }
  0x3b   :  { %173 = vperm.xlu1 %1749, %v1998_v14   ;;  %177 = vperm.xlu0 %1748, %v1993_v13  }
  0x3f   :  { %181 = vperm.xlu1 %1749, %v2010_v16   ;;  %185 = vperm.xlu0 %1748, %v2005_v15  }
  0x43   :  { %1750 = vset.pattern.permute.xlu1 %v1876_v18  ;;  %1751 = vset.pattern.permute.xlu0 %v1876_v18 }
  0x44   :  { %205 = vperm.xlu1 %1750, %v1926_v1   ;;  %208 = vperm.xlu0 %1751, %v1938_v4  }
  0x48   :  { %211 = vperm.xlu1 %1750, %v1921_v0   ;;  %217 = vperm.xlu0 %1751, %v1950_v6  }
  0x4c   :  { %214 = vperm.xlu1 %1750, %v1933_v3   ;;  %223 = vperm.xlu0 %1751, %v1962_v8  }
  0x50   :  { %220 = vperm.xlu1 %1750, %v1945_v5   ;;  %237 = vperm.xlu0 %1751, %v1974_v10  }
  0x54   :  { %226 = vperm.xlu1 %1750, %v1957_v7   ;;  %245 = vperm.xlu0 %1751, %v1986_v12  }
  0x58   :  { %241 = vperm.xlu1 %1750, %v1969_v9   ;;  %253 = vperm.xlu0 %1751, %v1998_v14  }
  0x5c   :  { %249 = vperm.xlu1 %1750, %v1981_v11   ;;  %261 = vperm.xlu0 %1751, %v2010_v16  }
  0x60   :  { %257 = vperm.xlu1 %1750, %v1993_v13   ;;  %1752 = vset.pattern.permute.xlu0 %v1877_v19 }
  0x61   :  { %285 = vperm.xlu0 %1752, %v1926_v1  }
  0x64   :  { %265 = vperm.xlu1 %1750, %v2005_v15  }
  0x65   :  { %294 = vperm.xlu0 %1752, %v1933_v3  }
  0x68   :  { %1753 = vset.pattern.permute.xlu1 %v1877_v19 }
  0x69   :  { %288 = vperm.xlu1 %1753, %v1938_v4   ;;  %300 = vperm.xlu0 %1752, %v1945_v5  }
  0x6d   :  { %291 = vperm.xlu1 %1753, %v1921_v0   ;;  %306 = vperm.xlu0 %1752, %v1957_v7  }
  0x71   :  { %297 = vperm.xlu1 %1753, %v1950_v6   ;;  %321 = vperm.xlu0 %1752, %v1969_v9  }
  0x75   :  { %303 = vperm.xlu1 %1753, %v1962_v8   ;;  %329 = vperm.xlu0 %1752, %v1981_v11  }
  0x79   :  { %317 = vperm.xlu1 %1753, %v1974_v10   ;;  %337 = vperm.xlu0 %1752, %v1993_v13  }
  0x7d   :  { %v2058_v20 = vpop.permute.xlu1 %43  ;;  %325 = vperm.xlu1 %1753, %v1986_v12   ;;  %345 = vperm.xlu0 %1752, %v2005_v15   ;;  %v2062_v21 = vpop.permute.xlu0 %37 }
  0x7e   :  { %3197 = vst [vmem:[#allocation5_spill] sm:$0xff] %v2058_v20  ;;  %3198 = vst [vmem:[#allocation6_spill] sm:$0xff] %v2062_v21 }
  0x81   :  { %v2064_v22 = vpop.permute.xlu1 %46  ;;  %333 = vperm.xlu1 %1753, %v1998_v14   ;;  %1755 = vset.pattern.permute.xlu0 %v1878_v23  ;;  %v2067_v24 = vpop.permute.xlu0 %40 }
  0x82   :  { %368 = vperm.xlu0 %1755, %v1938_v4  }
  0x85   :  { %v2070_v25 = vpop.permute.xlu1 %52  ;;  %341 = vperm.xlu1 %1753, %v2010_v16   ;;  %v2073_v26 = vpop.permute.xlu0 %49 }
  0x86   :  { %3199 = vst [vmem:[#allocation7_spill] sm:$0xff] %v2070_v25  ;;  %377 = vperm.xlu0 %1755, %v1950_v6  }
  0x89   :  { %v2076_v27 = vpop.permute.xlu1 %58  ;;  %1754 = vset.pattern.permute.xlu1 %v1878_v23  ;;  %v2078_v28 = vpop.permute.xlu0 %55 }
  0x8a   :  { %3200 = vst [vmem:[#allocation8_spill] sm:$0xff] %v2076_v27  ;;  %3201 = vst [vmem:[#allocation9_spill] sm:$0xff] %v2078_v28  ;;  %365 = vperm.xlu1 %1754, %v1926_v1   ;;  %383 = vperm.xlu0 %1755, %v1962_v8  }
  0x8d   :  { %v2082_v29 = vpop.permute.xlu1 %75  ;;  %v2084_v30 = vpop.permute.xlu0 %70 }
  0x8e   :  { %3202 = vst [vmem:[#allocation10_spill] sm:$0xff] %v2084_v30  ;;  %371 = vperm.xlu1 %1754, %v1921_v0   ;;  %397 = vperm.xlu0 %1755, %v1974_v10  }
  0x91   :  { %v2088_v31 = vpop.permute.xlu1 %85  ;;  %v2090_v32 = vpop.permute.xlu0 %80 }
  0x92   :  { %3203 = vst [vmem:[#allocation11_spill] sm:$0xff] %v2090_v32  ;;  %374 = vperm.xlu1 %1754, %v1933_v3   ;;  %405 = vperm.xlu0 %1755, %v1986_v12  }
  0x95   :  { %v2094_v33 = vpop.permute.xlu1 %95  ;;  %v2096_v34 = vpop.permute.xlu0 %90 }
  0x96   :  { %3204 = vst [vmem:[#allocation12_spill] sm:$0xff] %v2094_v33  ;;  %380 = vperm.xlu1 %1754, %v1945_v5   ;;  %413 = vperm.xlu0 %1755, %v1998_v14   ;;  %v3181_v33 = vmov 9  }
  0x99   :  { %v2100_v35 = vpop.permute.xlu1 %105  ;;  %v2102_v36 = vpop.permute.xlu0 %100 }
  0x9a   :  { %3205 = vst [vmem:[#allocation13_spill] sm:$0xff] %v2100_v35  ;;  %3206 = vst [vmem:[#allocation14_spill] sm:$0xff] %v2102_v36  ;;  %386 = vperm.xlu1 %1754, %v1957_v7   ;;  %421 = vperm.xlu0 %1755, %v2010_v16  }
  0x9e   :  { %v2106_v37 = vpop.permute.xlu1 %128  ;;  %401 = vperm.xlu1 %1754, %v1969_v9   ;;  %1756 = vset.pattern.permute.xlu0 %v1879_v38  ;;  %v2109_v39 = vpop.permute.xlu0 %125 }
  0x9f   :  { %3207 = vst [vmem:[#allocation15_spill] sm:$0xff] %v2109_v39  ;;  %445 = vperm.xlu0 %1756, %v1926_v1  }
  0xa2   :  { %v2112_v40 = vpop.permute.xlu1 %131  ;;  %409 = vperm.xlu1 %1754, %v1981_v11   ;;  %v2115_v41 = vpop.permute.xlu0 %134 }
  0xa3   :  { %3208 = vst [vmem:[#allocation16_spill] sm:$0xff] %v2112_v40  ;;  %454 = vperm.xlu0 %1756, %v1933_v3   ;;  %v3189_v40 = vmov 12  }
  0xa6   :  { %v2118_v42 = vpop.permute.xlu1 %137  ;;  %417 = vperm.xlu1 %1754, %v1993_v13   ;;  %v2121_v43 = vpop.permute.xlu0 %140 }
  0xa7   :  { %3209 = vst [vmem:[#allocation17_spill] sm:$0xff] %v2121_v43  ;;  %460 = vperm.xlu0 %1756, %v1945_v5  }
  0xaa   :  { %v2124_v44 = vpop.permute.xlu1 %143  ;;  %425 = vperm.xlu1 %1754, %v2005_v15   ;;  %v2127_v45 = vpop.permute.xlu0 %146 }
  0xab   :  { %3210 = vst [vmem:[#allocation18_spill] sm:$0xff] %v2124_v44  ;;  %3211 = vst [vmem:[#allocation19_spill] sm:$0xff] %v2127_v45  ;;  %466 = vperm.xlu0 %1756, %v1957_v7  }
  0xae   :  { %v2130_v46 = vpop.permute.xlu1 %157  ;;  %1757 = vset.pattern.permute.xlu1 %v1879_v38  ;;  %v2132_v47 = vpop.permute.xlu0 %161 }
  0xaf   :  { %3212 = vst [vmem:[#allocation20_spill] sm:$0xff] %v2130_v46  ;;  %448 = vperm.xlu1 %1757, %v1938_v4   ;;  %481 = vperm.xlu0 %1756, %v1969_v9  }
  0xb2   :  { %v2136_v48 = vpop.permute.xlu1 %165  ;;  %v2138_v49 = vpop.permute.xlu0 %169 }
  0xb3   :  { %3213 = vst [vmem:[#allocation21_spill] sm:$0xff] %v2136_v48  ;;  %451 = vperm.xlu1 %1757, %v1921_v0   ;;  %489 = vperm.xlu0 %1756, %v1981_v11  }
  0xb6   :  { %v2142_v50 = vpop.permute.xlu1 %173  ;;  %v2144_v51 = vpop.permute.xlu0 %177 }
  0xb7   :  { %3214 = vst [vmem:[#allocation22_spill] sm:$0xff] %v2144_v51  ;;  %457 = vperm.xlu1 %1757, %v1950_v6   ;;  %497 = vperm.xlu0 %1756, %v1993_v13   ;;  %v3254_v51 = vmov 9  }
  0xba   :  { %v2148_v52 = vpop.permute.xlu1 %181  ;;  %v2150_v53 = vpop.permute.xlu0 %185 }
  0xbb   :  { %3215 = vst [vmem:[#allocation23_spill] sm:$0xff] %v2148_v52  ;;  %3216 = vst [vmem:[#allocation24_spill] sm:$0xff] %v2150_v53  ;;  %463 = vperm.xlu1 %1757, %v1962_v8   ;;  %505 = vperm.xlu0 %1756, %v2005_v15  }
  0xbf   :  { %477 = vperm.xlu1 %1757, %v1974_v10   ;;  %v2155_v54 = vpop.permute.xlu1 %205  ;;  %1759 = vset.pattern.permute.xlu0 %v1880_v55  ;;  %v2157_v56 = vpop.permute.xlu0 %208 }
  0xc0   :  { %3217 = vst [vmem:[#allocation25_spill] sm:$0xff] %v2155_v54  ;;  %528 = vperm.xlu0 %1759, %v1938_v4  }
  0xc3   :  { %485 = vperm.xlu1 %1757, %v1986_v12   ;;  %v2161_v57 = vpop.permute.xlu1 %211  ;;  %v2163_v58 = vpop.permute.xlu0 %217 }
  0xc4   :  { %3218 = vst [vmem:[#allocation26_spill] sm:$0xff] %v2161_v57  ;;  %537 = vperm.xlu0 %1759, %v1950_v6   ;;  %v3187_v57 = vmov 11  }
  0xc7   :  { %493 = vperm.xlu1 %1757, %v1998_v14   ;;  %v2167_v59 = vpop.permute.xlu1 %214  ;;  %v2169_v60 = vpop.permute.xlu0 %223 }
  0xc8   :  { %3219 = vst [vmem:[#allocation27_spill] sm:$0xff] %v2169_v60  ;;  %543 = vperm.xlu0 %1759, %v1962_v8  }
  0xcb   :  { %501 = vperm.xlu1 %1757, %v2010_v16   ;;  %v2173_v61 = vpop.permute.xlu1 %220  ;;  %v2175_v62 = vpop.permute.xlu0 %237 }
  0xcc   :  { %3220 = vst [vmem:[#allocation28_spill] sm:$0xff] %v2173_v61  ;;  %3221 = vst [vmem:[#allocation29_spill] sm:$0xff] %v2175_v62  ;;  %557 = vperm.xlu0 %1759, %v1974_v10  }
  0xcf   :  { %1758 = vset.pattern.permute.xlu1 %v1880_v55  ;;  %v2178_v63 = vpop.permute.xlu1 %226  ;;  %v2180_v2 = vpop.permute.xlu0 %245  ;;  %v1881_v55 = vmov 7  }
  0xd0   :  { %3222 = vst [vmem:[#allocation30_spill] sm:$0xff] %v2178_v63  ;;  %3223 = vst [vmem:[#allocation31_spill] sm:$0xff] %v2180_v2  ;;  %525 = vperm.xlu1 %1758, %v1926_v1   ;;  %565 = vperm.xlu0 %1759, %v1986_v12  }
  0xd3   :  { %v2184_v17 = vpop.permute.xlu1 %241  ;;  %v2186_v18 = vpop.permute.xlu0 %253 }
  0xd4   :  { %531 = vperm.xlu1 %1758, %v1921_v0   ;;  %573 = vperm.xlu0 %1759, %v1998_v14  }
  0xd7   :  { %v2190_v19 = vpop.permute.xlu1 %249  ;;  %v2192_v23 = vpop.permute.xlu0 %261 }
  0xd8   :  { %3224 = vst [vmem:[#allocation32_spill] sm:$0xff] %v2192_v23  ;;  %534 = vperm.xlu1 %1758, %v1933_v3   ;;  %581 = vperm.xlu0 %1759, %v2010_v16  }
  0xdb   :  { %v2196_v38 = vpop.permute.xlu1 %257 }
  0xdc   :  { %3225 = vst [vmem:[#allocation33_spill] sm:$0xff] %v2196_v38  ;;  %540 = vperm.xlu1 %1758, %v1945_v5   ;;  %1760 = vset.pattern.permute.xlu0 %v1881_v55  ;;  %v2199_v62 = vpop.permute.xlu0 %285 }
  0xdd   :  { %3226 = vst [vmem:[#allocation34_spill] sm:$0xff] %v2199_v62  ;;  %605 = vperm.xlu0 %1760, %v1926_v1  }
  0xdf   :  { %v2202_v54 = vpop.permute.xlu1 %265 }
  0xe0   :  { %3227 = vst [vmem:[#allocation35_spill] sm:$0xff] %v2202_v54  ;;  %546 = vperm.xlu1 %1758, %v1957_v7   ;;  %v2205_v46 = vpop.permute.xlu0 %294 }
  0xe1   :  { %614 = vperm.xlu0 %1760, %v1933_v3  }
  0xe4   :  { %561 = vperm.xlu1 %1758, %v1969_v9   ;;  %v2209_v30 = vpop.permute.xlu1 %288  ;;  %v2211_v39 = vpop.permute.xlu0 %300 }
  0xe5   :  { %3228 = vst [vmem:[#allocation36_spill] sm:$0xff] %v2211_v39  ;;  %620 = vperm.xlu0 %1760, %v1945_v5  }
  0xe8   :  { %569 = vperm.xlu1 %1758, %v1981_v11   ;;  %v2215_v62 = vpop.permute.xlu1 %291  ;;  %v2217_v21 = vpop.permute.xlu0 %306 }
  0xe9   :  { %3229 = vst [vmem:[#allocation37_spill] sm:$0xff] %v2215_v62  ;;  %3230 = vst [vmem:[#allocation38_spill] sm:$0xff] %v2217_v21  ;;  %626 = vperm.xlu0 %1760, %v1957_v7  }
  0xec   :  { %577 = vperm.xlu1 %1758, %v1993_v13   ;;  %v2221_v23 = vpop.permute.xlu1 %297  ;;  %v2223_v52 = vpop.permute.xlu0 %321 }
  0xed   :  { %641 = vperm.xlu0 %1760, %v1969_v9  }
  0xf0   :  { %585 = vperm.xlu1 %1758, %v2005_v15   ;;  %v2227_v36 = vpop.permute.xlu1 %303  ;;  %v2229_v60 = vpop.permute.xlu0 %329 }
  0xf1   :  { %3231 = vst [vmem:[#allocation39_spill] sm:$0xff] %v2227_v36  ;;  %649 = vperm.xlu0 %1760, %v1981_v11  }
  0xf4   :  { %1761 = vset.pattern.permute.xlu1 %v1881_v55  ;;  %v2232_v44 = vpop.permute.xlu1 %317  ;;  %v2234_v28 = vpop.permute.xlu0 %337  ;;  %v3179_v55 = vmov 8  }
  0xf5   :  { %3232 = vst [vmem:[#allocation40_spill] sm:$0xff] %v2232_v44  ;;  %3233 = vst [vmem:[#allocation41_spill] sm:$0xff] %v2234_v28  ;;  %608 = vperm.xlu1 %1761, %v1938_v4   ;;  %657 = vperm.xlu0 %1760, %v1993_v13   ;;  %v3244_v28 = vmov 8  }
  0xf8   :  { %v2238_v21 = vpop.permute.xlu1 %325  ;;  %v2240_v54 = vpop.permute.xlu0 %345 }
  0xf9   :  { %3234 = vst [vmem:[#allocation42_spill] sm:$0xff] %v2238_v21  ;;  %3235 = vst [vmem:[#allocation43_spill] sm:$0xff] %v2240_v54  ;;  %611 = vperm.xlu1 %1761, %v1921_v0   ;;  %665 = vperm.xlu0 %1760, %v2005_v15   ;;  %v3185_v21 = vmov 10  }
  0xfc   :  { %v2244_v36 = vpop.permute.xlu1 %333 }
  0xfd   :  { %617 = vperm.xlu1 %1761, %v1950_v6   ;;  %1763 = vset.pattern.permute.xlu0 %v3179_v55  ;;  %v2248_v44 = vpop.permute.xlu0 %368 }
  0xfe   :  { %688 = vperm.xlu0 %1763, %v1938_v4  }
 0x100   :  { %v2251_v63 = vpop.permute.xlu1 %341 }
 0x101   :  { %3236 = vst [vmem:[#allocation44_spill] sm:$0xff] %v2251_v63  ;;  %623 = vperm.xlu1 %1761, %v1962_v8   ;;  %v2254_v54 = vpop.permute.xlu0 %377 }
 0x102   :  { %697 = vperm.xlu0 %1763, %v1950_v6  }
 0x105   :  { %637 = vperm.xlu1 %1761, %v1974_v10   ;;  %v2258_v35 = vpop.permute.xlu1 %365  ;;  %v2260_v53 = vpop.permute.xlu0 %383 }
 0x106   :  { %3237 = vst [vmem:[#allocation45_spill] sm:$0xff] %v2258_v35  ;;  %3238 = vst [vmem:[#allocation46_spill] sm:$0xff] %v2260_v53  ;;  %703 = vperm.xlu0 %1763, %v1962_v8  }
 0x109   :  { %645 = vperm.xlu1 %1761, %v1986_v12   ;;  %v2264_v55 = vpop.permute.xlu1 %371  ;;  %v2266_v27 = vpop.permute.xlu0 %397 }
 0x10a   :  { %3239 = vst [vmem:[#allocation47_spill] sm:$0xff] %v2264_v55  ;;  %3240 = vst [vmem:[#allocation48_spill] sm:$0xff] %v2266_v27  ;;  %721 = vperm.xlu0 %1763, %v1969_v9  }
 0x10d   :  { %653 = vperm.xlu1 %1761, %v1998_v14   ;;  %v2270_v63 = vpop.permute.xlu1 %374  ;;  %v2272_v45 = vpop.permute.xlu0 %405 }
 0x10e   :  { %3241 = vst [vmem:[#allocation49_spill] sm:$0xff] %v2270_v63  ;;  %3242 = vst [vmem:[#allocation50_spill] sm:$0xff] %v2272_v45  ;;  %733 = vperm.xlu0 %1763, %v1998_v14  }
 0x111   :  { %661 = vperm.xlu1 %1761, %v2010_v16   ;;  %v2276_v35 = vpop.permute.xlu1 %380  ;;  %v2278_v53 = vpop.permute.xlu0 %413 }
 0x112   :  { %3243 = vst [vmem:[#allocation51_spill] sm:$0xff] %v2276_v35  ;;  %741 = vperm.xlu0 %1763, %v2010_v16  }
 0x115   :  { %1762 = vset.pattern.permute.xlu1 %v3244_v28  ;;  %v2282_v27 = vpop.permute.xlu1 %386  ;;  %v2284_v38 = vpop.permute.xlu0 %421 }
 0x116   :  { %3245 = vst [vmem:[#allocation52_spill] sm:$0xff] %v2282_v27  ;;  %3246 = vst [vmem:[#allocation53_spill] sm:$0xff] %v2284_v38  ;;  %685 = vperm.xlu1 %1762, %v1926_v1   ;;  %1789 = vset.pattern.permute.xlu0 %v3181_v33 }
 0x117   :  { %768 = vperm.xlu0 %1789, %v1938_v4  }
 0x119   :  { %v2289_v39 = vpop.permute.xlu1 %401 }
 0x11a   :  { %691 = vperm.xlu1 %1762, %v1921_v0   ;;  %v2292_v35 = vpop.permute.xlu0 %445 }
 0x11b   :  { %3247 = vst [vmem:[#allocation54_spill] sm:$0xff] %v2292_v35  ;;  %771 = vperm.xlu0 %1789, %v1921_v0  }
 0x11d   :  { %v2295_v61 = vpop.permute.xlu1 %409 }
 0x11e   :  { %3248 = vst [vmem:[#allocation55_spill] sm:$0xff] %v2295_v61  ;;  %694 = vperm.xlu1 %1762, %v1933_v3   ;;  %v2298_v38 = vpop.permute.xlu0 %454  ;;  %v3282_v61 = vmov 12  }
 0x11f   :  { %3249 = vst [vmem:[#allocation56_spill] sm:$0xff] %v2298_v38  ;;  %774 = vperm.xlu0 %1789, %v1933_v3  }
 0x121   :  { %v2301_v27 = vpop.permute.xlu1 %417 }
 0x122   :  { %3250 = vst [vmem:[#allocation57_spill] sm:$0xff] %v2301_v27  ;;  %700 = vperm.xlu1 %1762, %v1945_v5   ;;  %v2304_v33 = vpop.permute.xlu0 %460 }
 0x123   :  { %3251 = vst [vmem:[#allocation58_spill] sm:$0xff] %v2304_v33  ;;  %777 = vperm.xlu0 %1789, %v1950_v6  }
 0x125   :  { %v2307_v25 = vpop.permute.xlu1 %425 }
 0x126   :  { %3252 = vst [vmem:[#allocation59_spill] sm:$0xff] %v2307_v25  ;;  %717 = vperm.xlu1 %1762, %v1974_v10   ;;  %v2310_v35 = vpop.permute.xlu0 %466  ;;  %v3183_v25 = vmov 15  }
 0x127   :  { %3253 = vst [vmem:[#allocation60_spill] sm:$0xff] %v2310_v35  ;;  %813 = vperm.xlu0 %1789, %v1998_v14  }
 0x12a   :  { %1764 = vset.pattern.permute.xlu1 %v3254_v51  ;;  %v2314_v43 = vpop.permute.xlu1 %448  ;;  %v2316_v45 = vpop.permute.xlu0 %481 }
 0x12b   :  { %765 = vperm.xlu1 %1764, %v1926_v1   ;;  %786 = vperm.xlu0 %1789, %v1957_v7  }
 0x12e   :  { %v2320_v27 = vpop.permute.xlu1 %451  ;;  %v2322_v33 = vpop.permute.xlu0 %489 }
 0x12f   :  { %3255 = vst [vmem:[#allocation61_spill] sm:$0xff] %v2320_v27  ;;  %3256 = vst [vmem:[#allocation62_spill] sm:$0xff] %v2322_v33  ;;  %797 = vperm.xlu1 %1764, %v1974_v10   ;;  %1802 = vset.pattern.permute.xlu0 %v3183_v25  ;;  %v3279_v33 = vmov 10  }
 0x130   :  { %1248 = vperm.xlu0 %1802, %v1938_v4  }
 0x132   :  { %v2327_v35 = vpop.permute.xlu1 %457  ;;  %v2329_v55 = vpop.permute.xlu0 %497 }
 0x133   :  { %3257 = vst [vmem:[#allocation63_spill] sm:$0xff] %v2329_v55  ;;  %801 = vperm.xlu1 %1764, %v1969_v9  }
 0x134   :  { %1803 = vset.pattern.permute.xlu0 %v3185_v21 }
 0x135   :  { %845 = vperm.xlu0 %1803, %v1926_v1  }
 0x136   :  { %v2334_v27 = vpop.permute.xlu1 %463  ;;  %v2336_v62 = vpop.permute.xlu0 %505 }
 0x137   :  { %3258 = vst [vmem:[#allocation64_spill] sm:$0xff] %v2334_v27  ;;  %3259 = vst [vmem:[#allocation65_spill] sm:$0xff] %v2336_v62  ;;  %1765 = vset.pattern.permute.xlu1 %v3244_v28 }
 0x138   :  { %725 = vperm.xlu1 %1765, %v1986_v12  }
 0x139   :  { %877 = vperm.xlu0 %1803, %v1974_v10  }
 0x13a   :  { %v2341_v25 = vpop.permute.xlu1 %477 }
 0x13b   :  { %3260 = vst [vmem:[#allocation66_spill] sm:$0xff] %v2341_v25  ;;  %v2343_v55 = vpop.permute.xlu0 %528 }
 0x13c   :  { %1766 = vset.pattern.permute.xlu1 %v3185_v21 }
 0x13d   :  { %848 = vperm.xlu1 %1766, %v1938_v4   ;;  %851 = vperm.xlu0 %1803, %v1921_v0  }
 0x13e   :  { %v2348_v2 = vpop.permute.xlu1 %485 }
 0x13f   :  { %3261 = vst [vmem:[#allocation67_spill] sm:$0xff] %v2348_v2  ;;  %v2350_v27 = vpop.permute.xlu0 %537 }
 0x141   :  { %1767 = vset.pattern.permute.xlu1 %v3244_v28  ;;  %857 = vperm.xlu0 %1803, %v1950_v6  }
 0x142   :  { %729 = vperm.xlu1 %1767, %v1981_v11   ;;  %v2355_v62 = vpop.permute.xlu1 %493 }
 0x143   :  { %v2357_v25 = vpop.permute.xlu0 %543 }
 0x144   :  { %3262 = vst [vmem:[#allocation68_spill] sm:$0xff] %v2357_v25 }
 0x145   :  { %897 = vperm.xlu0 %1803, %v1993_v13  }
 0x146   :  { %1768 = vset.pattern.permute.xlu1 %v3185_v21  ;;  %v2361_v32 = vpop.permute.xlu1 %501 }
 0x147   :  { %3263 = vst [vmem:[#allocation69_spill] sm:$0xff] %v2361_v32  ;;  %881 = vperm.xlu1 %1768, %v1969_v9   ;;  %v2364_v2 = vpop.permute.xlu0 %557 }
 0x148   :  { %3264 = vst [vmem:[#allocation70_spill] sm:$0xff] %v2364_v2  ;;  %v3270_v2 = vmov 11  }
 0x149   :  { %863 = vperm.xlu0 %1803, %v1962_v8  }
 0x14b   :  { %1769 = vset.pattern.permute.xlu1 %v3187_v57  ;;  %v2368_v20 = vpop.permute.xlu1 %525  ;;  %v2370_v48 = vpop.permute.xlu0 %565 }
 0x14c   :  { %3265 = vst [vmem:[#allocation71_spill] sm:$0xff] %v2368_v20  ;;  %3266 = vst [vmem:[#allocation72_spill] sm:$0xff] %v2370_v48  ;;  %925 = vperm.xlu1 %1769, %v1926_v1  }
 0x14d   :  { %866 = vperm.xlu0 %1803, %v1957_v7  }
 0x14f   :  { %v2374_v21 = vpop.permute.xlu1 %531  ;;  %v2376_v32 = vpop.permute.xlu0 %573 }
 0x150   :  { %3267 = vst [vmem:[#allocation73_spill] sm:$0xff] %v2374_v21  ;;  %1770 = vset.pattern.permute.xlu1 %v3254_v51 }
 0x151   :  { %805 = vperm.xlu1 %1770, %v1986_v12   ;;  %905 = vperm.xlu0 %1803, %v2005_v15  }
 0x153   :  { %v2381_v8 = vpop.permute.xlu1 %534  ;;  %v2383_v57 = vpop.permute.xlu0 %581 }
 0x154   :  { %3268 = vst [vmem:[#allocation74_spill] sm:$0xff] %v2381_v8  ;;  %3269 = vst [vmem:[#allocation75_spill] sm:$0xff] %v2383_v57 }
 0x155   :  { %1771 = vset.pattern.permute.xlu1 %v3270_v2  ;;  %1813 = vset.pattern.permute.xlu0 %v3270_v2 }
 0x156   :  { %957 = vperm.xlu1 %1771, %v1974_v10   ;;  %928 = vperm.xlu0 %1813, %v1938_v4  }
 0x157   :  { %v2389_v20 = vpop.permute.xlu1 %540 }
 0x158   :  { %3271 = vst [vmem:[#allocation76_spill] sm:$0xff] %v2389_v20  ;;  %v2391_v25 = vpop.permute.xlu0 %605 }
 0x159   :  { %3272 = vst [vmem:[#allocation77_spill] sm:$0xff] %v2391_v25 }
 0x15a   :  { %1772 = vset.pattern.permute.xlu1 %v3254_v51  ;;  %973 = vperm.xlu0 %1813, %v1998_v14  }
 0x15b   :  { %809 = vperm.xlu1 %1772, %v1981_v11   ;;  %v2396_v48 = vpop.permute.xlu1 %546 }
 0x15c   :  { %3273 = vst [vmem:[#allocation78_spill] sm:$0xff] %v2396_v48  ;;  %v2398_v57 = vpop.permute.xlu0 %614 }
 0x15d   :  { %3274 = vst [vmem:[#allocation79_spill] sm:$0xff] %v2398_v57 }
 0x15e   :  { %946 = vperm.xlu0 %1813, %v1957_v7  }
 0x15f   :  { %1773 = vset.pattern.permute.xlu1 %v3270_v2  ;;  %v562_v21 = vpop.permute.xlu1 %561 }
 0x160   :  { %961 = vperm.xlu1 %1773, %v1969_v9   ;;  %v2403_v20 = vpop.permute.xlu0 %620 }
 0x161   :  { %3275 = vst [vmem:[#allocation80_spill] sm:$0xff] %v2403_v20 }
 0x162   :  { %985 = vperm.xlu0 %1813, %v2005_v15  }
 0x163   :  { %v2406_v25 = vpop.permute.xlu1 %569 }
 0x164   :  { %3276 = vst [vmem:[#allocation81_spill] sm:$0xff] %v2406_v25  ;;  %1774 = vset.pattern.permute.xlu1 %v3189_v40  ;;  %v2409_v8 = vpop.permute.xlu0 %626 }
 0x165   :  { %3277 = vst [vmem:[#allocation82_spill] sm:$0xff] %v2409_v8  ;;  %1005 = vperm.xlu1 %1774, %v1926_v1   ;;  %v18_v8 = vlaneseq }
 0x166   :  { %1821 = vset.pattern.permute.xlu0 %v3189_v40 }
 0x167   :  { %v2413_v48 = vpop.permute.xlu1 %577  ;;  %1008 = vperm.xlu0 %1821, %v1938_v4   ;;  %v2428_v38 = vand.u32 127, %v18_v8 }
 0x168   :  { %3278 = vst [vmem:[#allocation83_spill] sm:$0xff] %v2413_v48  ;;  %v642_v57 = vpop.permute.xlu0 %641 }
 0x169   :  { %1775 = vset.pattern.permute.xlu1 %v3279_v33  ;;  %vm61_vm0 = vcmp.eq.s32.totalorder %v2428_v38, %v2067_v24  ;;  %vm149_vm1 = vcmp.eq.s32.totalorder %v2428_v38, %v2106_v37  ;;  %vm229_vm2 = vcmp.eq.s32.totalorder %v2428_v38, %v2157_v56  ;;  %vm309_vm3 = vcmp.eq.s32.totalorder %v2428_v38, %v2209_v30 }
 0x16a   :  { %854 = vperm.xlu1 %1775, %v1933_v3   ;;  %v189_v8 = vsel %vm149_vm1, %v2132_v47, 0.0  ;;  %vm389_vm4 = vcmp.eq.s32.totalorder %v2428_v38, %v2248_v44  ;;  %v349_v47 = vsel %vm309_vm3, %v2223_v52, 0.0  ;;  %vm469_vm5 = vcmp.eq.s32.totalorder %v2428_v38, %v2314_v43 }
 0x16b   :  { %v2418_v20 = vpop.permute.xlu1 %585  ;;  %1041 = vperm.xlu0 %1821, %v1969_v9   ;;  %vm549_vm6 = vcmp.eq.s32.totalorder %v2428_v38, %v2343_v55  ;;  %v3191_v43 = vmov 13   ;;  %vm64_vm11 = vcmp.eq.s32.totalorder %v2428_v38, %v2073_v26  ;;  %vm152_vm12 = vcmp.eq.s32.totalorder %v2428_v38, %v2118_v42 }
 0x16c   :  { %3280 = vst [vmem:[#allocation84_spill] sm:$0xff] %v2418_v20  ;;  %v2421_v25 = vpop.permute.xlu0 %649  ;;  %vm232_vm13 = vcmp.eq.s32.totalorder %v2428_v38, %v2163_v58  ;;  %vm312_vm14 = vcmp.eq.s32.totalorder %v2428_v38, %v2221_v23  ;;  %vm392_vm15 = vcmp.eq.s32.totalorder %v2428_v38, %v2254_v54  ;;  %vm552_vm1 = vcmp.eq.s32.totalorder %v2428_v38, %v2350_v27 }
 0x16d   :  { %v272_v26 = vsel %vm232_vm13, %v2186_v18, 0.0 }
 0x16e   :  { %885 = vperm.xlu1 %1775, %v1986_v12  }
 0x16f   :  { %1014 = vperm.xlu0 %1821, %v1933_v3  }
 0x170   :  { %v609_v40 = vpop.permute.xlu1 %608  ;;  %v2425_v48 = vpop.permute.xlu0 %657 }
 0x171   :  { %3281 = vst [vmem:[#allocation85_spill] sm:$0xff] %v2425_v48  ;;  %v109_v48 = vsel %vm61_vm0, %v2082_v29, 0.0  ;;  %v429_v29 = vsel %vm389_vm4, %v2289_v39, 0.0  ;;  %vm629_vm7 = vcmp.eq.s32.totalorder %v2428_v38, %v609_v40  ;;  %v589_v39 = vsel %vm549_vm6, %v562_v21, 0.0 }
 0x172   :  { %1776 = vset.pattern.permute.xlu1 %v3282_v61  ;;  %v197_v24 = vadd.f32 %v189_v8, %v109_v48  ;;  %vm472_vm0 = vcmp.eq.s32.totalorder %v2428_v38, %v2327_v35  ;;  %vm151_vm6 = vcmp.eq.s32.totalorder %v2428_v38, %v2115_v41 }
 0x173   :  { %1037 = vperm.xlu1 %1776, %v1974_v10   ;;  %1053 = vperm.xlu0 %1821, %v1998_v14  }
 0x174   :  { %v2432_v20 = vpop.permute.xlu1 %611  ;;  %v2434_v63 = vpop.permute.xlu0 %665 }
 0x175   :  { %3283 = vst [vmem:[#allocation86_spill] sm:$0xff] %v2432_v20  ;;  %3284 = vst [vmem:[#allocation87_spill] sm:$0xff] %v2434_v63  ;;  %v269_v20 = vsel %vm229_vm2, %v2184_v17, 0.0 }
 0x176   :  { %v277_v56 = vadd.f32 %v269_v20, %v197_v24  ;;  %v509_v20 = vsel %vm469_vm5, %v2316_v45, 0.0  ;;  %v669_v24 = vsel %vm629_vm7, %v642_v57, 0.0  ;;  %vm63_vm7 = vcmp.eq.s32.totalorder %v2428_v38, %v2064_v22 }
 0x177   :  { %1777 = vset.pattern.permute.xlu1 %v3244_v28  ;;  %1061 = vperm.xlu0 %1821, %v2010_v16  }
 0x178   :  { %737 = vperm.xlu1 %1777, %v1993_v13   ;;  %v2448_v63 = vpop.permute.xlu1 %617  ;;  %v357_v17 = vadd.f32 %v349_v47, %v277_v56 }
 0x179   :  { %v689_v37 = vpop.permute.xlu0 %688  ;;  %vm632_vm2 = vcmp.eq.s32.totalorder %v2428_v38, %v2448_v63 }
 0x17a   :  { %v437_v44 = vadd.f32 %v429_v29, %v357_v17  ;;  %vm709_vm8 = vcmp.eq.s32.totalorder %v2428_v38, %v689_v37 }
 0x17b   :  { %1065 = vperm.xlu0 %1821, %v2005_v15  }
 0x17c   :  { %1778 = vset.pattern.permute.xlu1 %v3279_v33  ;;  %v2460_v48 = vpop.permute.xlu1 %623  ;;  %v517_v8 = vadd.f32 %v509_v20, %v437_v44  ;;  %v112_v20 = vsel %vm64_vm11, %v2096_v34, 0.0  ;;  %v192_v44 = vsel %vm152_vm12, %v2142_v50, 0.0  ;;  %v352_v50 = vsel %vm312_vm14, %v2244_v36, 0.0 }
 0x17d   :  { %889 = vperm.xlu1 %1778, %v1981_v11   ;;  %v698_v30 = vpop.permute.xlu0 %697  ;;  %v200_v42 = vadd.f32 %v192_v44, %v112_v20  ;;  %v512_v36 = vsel %vm472_vm0, %v2355_v62, 0.0 }
 0x17e   :  { %v597_v47 = vadd.f32 %v589_v39, %v517_v8  ;;  %vm712_vm9 = vcmp.eq.s32.totalorder %v2428_v38, %v698_v30  ;;  %v432_v8 = vsel %vm392_vm15, %v2278_v53, 0.0  ;;  %v592_v53 = vsel %vm552_vm1, %v2376_v32, 0.0 }
 0x17f   :  { %1827 = vset.pattern.permute.xlu0 %v3191_v43  ;;  %v280_v58 = vadd.f32 %v272_v26, %v200_v42  ;;  %v3287_v42 = vmov 15  }
 0x180   :  { %v2468_v52 = vpop.permute.xlu1 %637  ;;  %1088 = vperm.xlu0 %1827, %v1938_v4   ;;  %v677_v21 = vadd.f32 %v669_v24, %v597_v47 }
 0x181   :  { %1779 = vset.pattern.permute.xlu1 %v3270_v2  ;;  %v704_v55 = vpop.permute.xlu0 %703  ;;  %v360_v18 = vadd.f32 %v352_v50, %v280_v58 }
 0x182   :  { %931 = vperm.xlu1 %1779, %v1921_v0   ;;  %vm714_vm10 = vcmp.eq.s32.totalorder %v2428_v38, %v704_v55 }
 0x183   :  { %v440_v23 = vadd.f32 %v432_v8, %v360_v18  ;;  %v191_v18 = vsel %vm151_vm6, %v2138_v49, 0.0 }
 0x184   :  { %v2474_v45 = vpop.permute.xlu1 %645  ;;  %1121 = vperm.xlu0 %1827, %v1969_v9  }
 0x185   :  { %v722_v40 = vpop.permute.xlu0 %721  ;;  %v520_v24 = vadd.f32 %v512_v36, %v440_v23 }
 0x186   :  { %v749_v56 = vsel %vm709_vm8, %v722_v40, 0.0  ;;  %1780 = vset.pattern.permute.xlu1 %v3191_v43  ;;  %vm231_vm8 = vcmp.eq.s32.totalorder %v2428_v38, %v2167_v59  ;;  %v3289_v59 = vld [vmem:[#allocation49_spill] sm:$0xff] }
 0x187   :  { %v2479_v4 = vadd.f32 %v749_v56, %v677_v21  ;;  %1085 = vperm.xlu1 %1780, %v1926_v1   ;;  %v600_v47 = vadd.f32 %v592_v53, %v520_v24  ;;  %v3193_v21 = vmov 14   ;;  %v271_v41 = vsel %vm231_vm8, %v2190_v19, 0.0 }
 0x188   :  { %v654_v57 = vpop.permute.xlu1 %653  ;;  %1091 = vperm.xlu0 %1827, %v1921_v0  }
 0x189   :  { %v734_v29 = vpop.permute.xlu0 %733  ;;  %v672_v35 = vsel %vm632_vm2, %v654_v57, 0.0 }
 0x18a   :  { %v752_v37 = vsel %vm712_vm9, %v734_v29, 0.0  ;;  %v680_v40 = vadd.f32 %v672_v35, %v600_v47  ;;  %vm311_vm9 = vcmp.eq.s32.totalorder %v2428_v38, %v2205_v46  ;;  %v3290_v46 = vld [vmem:[#allocation56_spill] sm:$0xff] }
 0x18b   :  { %1781 = vset.pattern.permute.xlu1 %v3254_v51  ;;  %v351_v22 = vsel %vm311_vm9, %v2229_v60, 0.0  ;;  %vm471_vm11 = vcmp.eq.s32.totalorder %v2428_v38, %v3290_v46  ;;  %v3292_v60 = vld [vmem:[#allocation62_spill] sm:$0xff] }
 0x18c   :  { %780 = vperm.xlu1 %1781, %v1945_v5   ;;  %v2488_v9 = vpop.permute.xlu1 %661  ;;  %1129 = vperm.xlu0 %1827, %v1981_v11   ;;  %v760_v56 = vadd.f32 %v752_v37, %v680_v40  ;;  %v511_v40 = vsel %vm471_vm11, %v3292_v60, 0.0 }
 0x18d   :  { %v742_v17 = vpop.permute.xlu0 %741 }
 0x18e   :  { %v2495_v30 = vsel %vm714_vm10, %v742_v17, 0.0  ;;  %vm391_vm10 = vcmp.eq.s32.totalorder %v2428_v38, %v3289_v59  ;;  %v3300_v59 = vld [vmem:[#allocation5_spill] sm:$0xff] }
 0x18f   :  { %vm62_vm2 = vcmp.eq.s32.totalorder %v2428_v38, %v3300_v59  ;;  %v3310_v59 = vld [vmem:[#allocation67_spill] sm:$0xff] }
 0x190   :  { %1782 = vset.pattern.permute.xlu1 %v3270_v2  ;;  %1097 = vperm.xlu0 %1827, %v1950_v6  }
 0x191   :  { %934 = vperm.xlu1 %1782, %v1933_v3   ;;  %v2503_v39 = vpop.permute.xlu1 %685 }
 0x192   :  { %v769_v34 = vpop.permute.xlu0 %768 }
 0x193   :  { %vm789_vm4 = vcmp.eq.s32.totalorder %v2428_v38, %v769_v34 }
 0x194   :  { %1133 = vperm.xlu0 %1827, %v1998_v14  }
 0x195   :  { %965 = vperm.xlu1 %1782, %v1986_v12   ;;  %v2513_v3 = vpop.permute.xlu1 %691 }
 0x196   :  { %v2519_v54 = vpop.permute.xlu0 %771 }
 0x198   :  { %1141 = vperm.xlu0 %1827, %v2010_v16  }
 0x199   :  { %1783 = vset.pattern.permute.xlu1 %v3191_v43  ;;  %v2525_v55 = vpop.permute.xlu1 %694 }
 0x19a   :  { %1117 = vperm.xlu1 %1783, %v1974_v10   ;;  %v2530_v27 = vpop.permute.xlu0 %774  ;;  %vm711_vm15 = vcmp.eq.s32.totalorder %v2428_v38, %v2525_v55  ;;  %v3299_v55 = vld [vmem:[#allocation21_spill] sm:$0xff] }
 0x19b   :  { %vm791_vm0 = vcmp.eq.s32.totalorder %v2428_v38, %v2530_v27  ;;  %v3301_v27 = vld [vmem:[#allocation26_spill] sm:$0xff] }
 0x19c   :  { %1145 = vperm.xlu0 %1827, %v2005_v15  }
 0x19d   :  { %v2533_v62 = vpop.permute.xlu1 %700 }
 0x19e   :  { %1784 = vset.pattern.permute.xlu1 %v3254_v51  ;;  %v778_v32 = vpop.permute.xlu0 %777 }
 0x19f   :  { %817 = vperm.xlu1 %1784, %v1993_v13   ;;  %vm792_vm3 = vcmp.eq.s32.totalorder %v2428_v38, %v778_v32 }
 0x1a0   :  { %1832 = vset.pattern.permute.xlu0 %v3193_v21 }
 0x1a1   :  { %v2539_v63 = vpop.permute.xlu1 %717  ;;  %1197 = vperm.xlu0 %1832, %v1974_v10  }
 0x1a2   :  { %v814_v57 = vpop.permute.xlu0 %813 }
 0x1a3   :  { %v832_v29 = vsel %vm792_vm3, %v814_v57, 0.0  ;;  %1785 = vset.pattern.permute.xlu1 %v3270_v2  ;;  %v3294_v57 = vld [vmem:[#allocation74_spill] sm:$0xff]  ;;  %vm230_vm3 = vcmp.eq.s32.totalorder %v2428_v38, %v3301_v27 }
 0x1a4   :  { %v2543_v17 = vadd.f32 %v832_v29, %v760_v56  ;;  %969 = vperm.xlu1 %1785, %v1981_v11   ;;  %vm551_vm13 = vcmp.eq.s32.totalorder %v2428_v38, %v3294_v57  ;;  %v3295_v29 = vld [vmem:[#allocation79_spill] sm:$0xff]  ;;  %v3304_v57 = vld [vmem:[#allocation37_spill] sm:$0xff] }
 0x1a5   :  { %1177 = vperm.xlu0 %1832, %v1950_v6   ;;  %vm631_vm14 = vcmp.eq.s32.totalorder %v2428_v38, %v3295_v29 }
 0x1a6   :  { %v2547_v20 = vpop.permute.xlu1 %765  ;;  %v2549_v44 = vpop.permute.xlu0 %786 }
 0x1a7   :  { %3285 = vst [vmem:[#allocation88_spill] sm:$0xff] %v2549_v44 }
 0x1a8   :  { %1786 = vset.pattern.permute.xlu1 %v3282_v61 }
 0x1a9   :  { %1011 = vperm.xlu1 %1786, %v1921_v0   ;;  %1217 = vperm.xlu0 %1832, %v1993_v13  }
 0x1aa   :  { %v2554_v10 = vpop.permute.xlu1 %797 }
 0x1ab   :  { %v2556_v37 = vpop.permute.xlu0 %1248 }
 0x1ac   :  { %3286 = vst [vmem:[#allocation89_spill] sm:$0xff] %v2556_v37 }
 0x1ad   :  { %1787 = vset.pattern.permute.xlu1 %v3193_v21  ;;  %1225 = vperm.xlu0 %1832, %v2005_v15  }
 0x1ae   :  { %1165 = vperm.xlu1 %1787, %v1926_v1   ;;  %v802_v6 = vpop.permute.xlu1 %801 }
 0x1af   :  { %v829_v11 = vsel %vm789_vm4, %v802_v6, 0.0 }
 0x1b0   :  { %v2563_v26 = vadd.f32 %v829_v11, %v2479_v4  ;;  %v846_v0 = vpop.permute.xlu0 %845  ;;  %v2630_v11 = vld [vmem:[%s3174_s0 + $0x30] sm:$0xff] }
 0x1b1   :  { %1834 = vset.pattern.permute.xlu0 %v3287_v42  ;;  %vm868_vm5 = vcmp.eq.s32.totalorder %v2428_v38, %v846_v0  ;;  %v671_v0 = vsel %vm631_vm14, %v2421_v25, 0.0  ;;  %v2646_v25 = vld [vmem:[%s3174_s0 + $0x20] sm:$0xff] }
 0x1b2   :  { %1788 = vset.pattern.permute.xlu1 %v3244_v28  ;;  %1297 = vperm.xlu0 %1834, %v1993_v13   ;;  %3298 = vst [vmem:[#allocation56_spill] sm:$0xff] %v2646_v25 }
 0x1b3   :  { %706 = vperm.xlu1 %1788, %v1957_v7   ;;  %v2570_v34 = vpop.permute.xlu1 %725 }
 0x1b4   :  { %v878_v50 = vpop.permute.xlu0 %877 }
 0x1b5   :  { %v2572_v1 = vsel %vm868_vm5, %v878_v50, 0.0  ;;  %vm310_vm5 = vcmp.eq.s32.totalorder %v2428_v38, %v3304_v57 }
 0x1b6   :  { %1301 = vperm.xlu0 %1834, %v2010_v16  }
 0x1b7   :  { %1790 = vset.pattern.permute.xlu1 %v3279_v33 }
 0x1b8   :  { %860 = vperm.xlu1 %1790, %v1945_v5   ;;  %v2577_v4 = vpop.permute.xlu1 %848  ;;  %v2579_v58 = vpop.permute.xlu0 %851 }
 0x1b9   :  { %vm869_vm4 = vcmp.eq.s32.totalorder %v2428_v38, %v2577_v4  ;;  %v2670_v4 = vld [vmem:[%s3175_s1 + $0x18] sm:$0xff] }
 0x1bc   :  { %893 = vperm.xlu1 %1790, %v1998_v14   ;;  %v2582_v13 = vpop.permute.xlu0 %857  ;;  %v111_v14 = vsel %vm63_vm7, %v2088_v31, 0.0  ;;  %v3291_v31 = vld [vmem:[#allocation55_spill] sm:$0xff] }
 0x1bd   :  { %v730_v7 = vpop.permute.xlu1 %729  ;;  %v199_v36 = vadd.f32 %v191_v18, %v111_v14  ;;  %v431_v24 = vsel %vm391_vm10, %v3291_v31, 0.0  ;;  %v3302_v31 = vld [vmem:[#allocation11_spill] sm:$0xff] }
 0x1be   :  { %v751_v14 = vsel %vm711_vm15, %v730_v7, 0.0  ;;  %vm870_vm15 = vcmp.eq.s32.totalorder %v2428_v38, %v2579_v58  ;;  %v2730_v58 = vld [vmem:[%s3174_s0 + $0x28] sm:$0xff] }
 0x1bf   :  { %v279_v53 = vadd.f32 %v271_v41, %v199_v36  ;;  %v3297_v36 = vld [vmem:[#allocation16_spill] sm:$0xff] }
 0x1c0   :  { %1791 = vset.pattern.permute.xlu1 %v3282_v61  ;;  %v2585_v8 = vpop.permute.xlu0 %897  ;;  %vm150_vm1 = vcmp.eq.s32.totalorder %v2428_v38, %v3297_v36 }
 0x1c1   :  { %1045 = vperm.xlu1 %1791, %v1986_v12   ;;  %v1836_v12 = vld [vmem:[%s3174_s0 + $0x8] sm:$0xff]  ;;  %v359_v19 = vadd.f32 %v351_v22, %v279_v53  ;;  %v190_v7 = vsel %vm150_vm1, %v3299_v55, 0.0  ;;  %v3308_v55 = vld [vmem:[#allocation61_spill] sm:$0xff] }
 0x1c2   :  { %v882_v16 = vpop.permute.xlu1 %881  ;;  %vm470_vm9 = vcmp.eq.s32.totalorder %v2428_v38, %v3308_v55 }
 0x1c3   :  { %v439_v56 = vadd.f32 %v431_v24, %v359_v19  ;;  %v110_v24 = vsel %vm62_vm2, %v3302_v31, 0.0  ;;  %v3303_v19 = vld [vmem:[#allocation31_spill] sm:$0xff]  ;;  %v909_v60 = vsel %vm869_vm4, %v882_v16, 0.0  ;;  %v510_v27 = vsel %vm470_vm9, %v3310_v59, 0.0  ;;  %v2689_v31 = vld [vmem:[%s3175_s1 + $0x8] sm:$0xff]  ;;  %v2743_v59 = vld [vmem:[%s3174_s0 + $0x18] sm:$0xff] }
 0x1c4   :  { %v2590_v5 = vpop.permute.xlu0 %863  ;;  %vm713_vm9 = vcmp.eq.s32.totalorder %v2428_v38, %v2533_v62 }
 0x1c5   :  { %3288 = vst [vmem:[#allocation90_spill] sm:$0xff] %v2590_v5  ;;  %1792 = vset.pattern.permute.xlu1 %v3193_v21 }
 0x1c6   :  { %1168 = vperm.xlu1 %1792, %v1836_v12  }
 0x1c7   :  { %v2605_v49 = vpop.permute.xlu1 %925 }
 0x1c8   :  { %v867_v23 = vpop.permute.xlu0 %866 }
 0x1c9   :  { %vm875_vm12 = vcmp.eq.s32.totalorder %v2428_v38, %v867_v23 }
 0x1ca   :  { %1793 = vset.pattern.permute.xlu1 %v3244_v28  ;;  %v3296_v28 = vld [vmem:[#allocation81_spill] sm:$0xff] }
 0x1cb   :  { %745 = vperm.xlu1 %1793, %v2005_v15   ;;  %v591_v6 = vsel %vm551_vm13, %v3296_v28, 0.0  ;;  %v519_v15 = vadd.f32 %v511_v40, %v439_v56  ;;  %v198_v56 = vadd.f32 %v190_v7, %v110_v24  ;;  %v3305_v28 = vld [vmem:[#allocation42_spill] sm:$0xff]  ;;  %v3309_v7 = vld [vmem:[#allocation73_spill] sm:$0xff]  ;;  %v3312_v24 = vld [vmem:[#allocation72_spill] sm:$0xff]  ;;  %vm790_vm13 = vcmp.eq.s32.totalorder %v2428_v38, %v2519_v54 }
 0x1cc   :  { %v2616_v35 = vpop.permute.xlu1 %805  ;;  %v906_v47 = vpop.permute.xlu0 %905  ;;  %vm550_vm10 = vcmp.eq.s32.totalorder %v2428_v38, %v3309_v7 }
 0x1cd   :  { %v2619_v32 = vsel %vm875_vm12, %v906_v47, 0.0  ;;  %v599_v12 = vadd.f32 %v591_v6, %v519_v15  ;;  %v270_v47 = vsel %vm230_vm3, %v3303_v19, 0.0  ;;  %v350_v6 = vsel %vm310_vm5, %v3305_v28, 0.0  ;;  %v3306_v15 = vld [vmem:[#allocation47_spill] sm:$0xff] }
 0x1ce   :  { %3293 = vst [vmem:[#allocation49_spill] sm:$0xff] %v2619_v32  ;;  %v278_v16 = vadd.f32 %v270_v47, %v198_v56  ;;  %vm390_vm7 = vcmp.eq.s32.totalorder %v2428_v38, %v3306_v15  ;;  %v590_v19 = vsel %vm550_vm10, %v3312_v24, 0.0  ;;  %v3313_v56 = vld [vmem:[#allocation86_spill] sm:$0xff]  ;;  %vm710_vm12 = vcmp.eq.s32.totalorder %v2428_v38, %v2513_v3  ;;  %v2753_v24 = vld [vmem:[%s3175_s1 + $0x10] sm:$0xff] }
 0x1cf   :  { %1794 = vset.pattern.permute.xlu1 %v3254_v51  ;;  %v679_v41 = vadd.f32 %v671_v0, %v599_v12  ;;  %v917_v0 = vadd.f32 %v909_v60, %v2563_v26  ;;  %v3307_v12 = vld [vmem:[#allocation50_spill] sm:$0xff]  ;;  %vm630_vm11 = vcmp.eq.s32.totalorder %v2428_v38, %v3313_v56  ;;  %v1846_v56 = vld [vmem:[%s3175_s1] sm:$0xff] }
 0x1d0   :  { %783 = vperm.xlu1 %1794, %v2630_v11   ;;  %v358_v36 = vadd.f32 %v350_v6, %v278_v16  ;;  %v670_v57 = vsel %vm630_vm11, %v2474_v45, 0.0  ;;  %v750_v6 = vsel %vm710_vm12, %v2570_v34, 0.0  ;;  %v1841_v16 = vld [vmem:[%s3174_s0] sm:$0xff] }
 0x1d1   :  { %v2634_v50 = vpop.permute.xlu1 %957  ;;  %v929_v18 = vpop.permute.xlu0 %928  ;;  %v759_v22 = vadd.f32 %v751_v14, %v679_v41  ;;  %v430_v14 = vsel %vm390_vm7, %v3307_v12, 0.0 }
 0x1d2   :  { %vm949_vm6 = vcmp.eq.s32.totalorder %v2428_v38, %v929_v18 }
 0x1d4   :  { %1795 = vset.pattern.permute.xlu1 %v3270_v2 }
 0x1d5   :  { %937 = vperm.xlu1 %1795, %v2646_v25   ;;  %v2649_v23 = vpop.permute.xlu0 %973 }
 0x1d6   :  { %v810_v53 = vpop.permute.xlu1 %809 }
 0x1d7   :  { %v831_v46 = vsel %vm791_vm0, %v810_v53, 0.0 }
 0x1d8   :  { %v2660_v40 = vadd.f32 %v831_v46, %v759_v22  ;;  %v438_v46 = vadd.f32 %v430_v14, %v358_v36  ;;  %v2719_v14 = vld [vmem:[%s3175_s1 + $0x30] sm:$0xff] }
 0x1d9   :  { %1796 = vset.pattern.permute.xlu1 %v3282_v61  ;;  %v947_v29 = vpop.permute.xlu0 %946 }
 0x1da   :  { %1049 = vperm.xlu1 %1796, %v2670_v4   ;;  %vm955_vm8 = vcmp.eq.s32.totalorder %v2428_v38, %v947_v29  ;;  %v518_v60 = vadd.f32 %v510_v27, %v438_v46 }
 0x1db   :  { %v962_v18 = vpop.permute.xlu1 %961 }
 0x1dc   :  { %v989_v41 = vsel %vm949_vm6, %v962_v18, 0.0  ;;  %v598_v28 = vadd.f32 %v590_v19, %v518_v60 }
 0x1dd   :  { %v997_v22 = vadd.f32 %v989_v41, %v917_v0  ;;  %v986_v53 = vpop.permute.xlu0 %985  ;;  %v830_v0 = vsel %vm790_vm13, %v2616_v35, 0.0  ;;  %vm872_vm13 = vcmp.eq.s32.totalorder %v2428_v38, %v2582_v13  ;;  %v3343_v13 = vld [vmem:[#allocation35_spill] sm:$0xff] }
 0x1de   :  { %1797 = vset.pattern.permute.xlu1 %v3193_v21  ;;  %v2684_v26 = vsel %vm955_vm8, %v986_v53, 0.0  ;;  %v678_v45 = vadd.f32 %v670_v57, %v598_v28  ;;  %v2772_v28 = vld [vmem:[%s3175_s1 + $0x38] sm:$0xff] }
 0x1df   :  { %3311 = vst [vmem:[#allocation55_spill] sm:$0xff] %v2684_v26  ;;  %1201 = vperm.xlu1 %1797, %v2689_v31   ;;  %3317 = vst [vmem:[#allocation81_spill] sm:$0xff] %v2772_v28 }
 0x1e0   :  { %v2693_v47 = vpop.permute.xlu1 %1005  ;;  %v758_v18 = vadd.f32 %v750_v6, %v678_v45  ;;  %v1331_v45 = vld [vmem:[%s3176_s2 + $0x38] sm:$0xff] }
 0x1e1   :  { %1671 = vmatprep.subr.mxu0 %v1331_v45 }
 0x1e2   :  { %v1009_v29 = vpop.permute.xlu0 %1008  ;;  %v838_v34 = vadd.f32 %v830_v0, %v758_v18  ;;  %1672 = vmatpush3.msra.mxu0 %v1331_v45  ;;  %v2789_v0 = vld [vmem:[%s3175_s1 + $0x28] sm:$0xff]  ;;  %v1326_v45 = vld [vmem:[%s3176_s2 + $0x10] sm:$0xff] }
 0x1e3   :  { %1798 = vset.pattern.permute.xlu1 %v3287_v42  ;;  %vm1029_vm14 = vcmp.eq.s32.totalorder %v2428_v38, %v1009_v29 }
 0x1e4   :  { %1245 = vperm.xlu1 %1798, %v1841_v16  }
 0x1e5   :  { %v2708_v15 = vpop.permute.xlu1 %854 }
 0x1e6   :  { %v1042_v3 = vpop.permute.xlu0 %1041 }
 0x1e7   :  { %v1069_v54 = vsel %vm1029_vm14, %v1042_v3, 0.0 }
 0x1e8   :  { %v2713_v12 = vadd.f32 %v1069_v54, %v997_v22  ;;  %1799 = vset.pattern.permute.xlu1 %v3254_v51  ;;  %v1329_v54 = vld [vmem:[%s3176_s2 + $0x28] sm:$0xff] }
 0x1e9   :  { %821 = vperm.xlu1 %1799, %v2719_v14   ;;  %v886_v41 = vpop.permute.xlu1 %885 }
 0x1ea   :  { %v910_v35 = vsel %vm870_vm15, %v886_v41, 0.0  ;;  %v2722_v36 = vpop.permute.xlu0 %1014 }
 0x1eb   :  { %v2724_v55 = vadd.f32 %v910_v35, %v838_v34  ;;  %v1328_v34 = vld [vmem:[%s3176_s2 + $0x20] sm:$0xff]  ;;  %v1327_v35 = vld [vmem:[%s3176_s2 + $0x18] sm:$0xff] }
 0x1ed   :  { %1800 = vset.pattern.permute.xlu1 %v3270_v2 }
 0x1ee   :  { %940 = vperm.xlu1 %1800, %v2730_v58   ;;  %v2733_v7 = vpop.permute.xlu1 %1037  ;;  %v2735_v22 = vpop.permute.xlu0 %1053 }
 0x1ef   :  { %3314 = vst [vmem:[#allocation62_spill] sm:$0xff] %v2735_v22 }
 0x1f2   :  { %1801 = vset.pattern.permute.xlu1 %v3191_v43  ;;  %v2738_v53 = vpop.permute.xlu0 %1061  ;;  %v1324_v43 = vld [vmem:[%s3176_s2] sm:$0xff] }
 0x1f3   :  { %3315 = vst [vmem:[#allocation74_spill] sm:$0xff] %v2738_v53  ;;  %1094 = vperm.xlu1 %1801, %v2743_v59   ;;  %v2746_v27 = vpop.permute.xlu1 %737  ;;  %v3323_v53 = vld [vmem:[#allocation7_spill] sm:$0xff] }
 0x1f4   :  { %vm65_vm2 = vcmp.eq.s32.totalorder %v2428_v38, %v3323_v53  ;;  %v3330_v53 = vld [vmem:[#allocation51_spill] sm:$0xff] }
 0x1f5   :  { %vm393_vm5 = vcmp.eq.s32.totalorder %v2428_v38, %v3330_v53 }
 0x1f6   :  { %v2748_v46 = vpop.permute.xlu0 %1065 }
 0x1f7   :  { %3316 = vst [vmem:[#allocation79_spill] sm:$0xff] %v2748_v46  ;;  %1125 = vperm.xlu1 %1801, %v2753_v24  }
 0x1f8   :  { %v2756_v19 = vpop.permute.xlu1 %889 }
 0x1fb   :  { %1804 = vset.pattern.permute.xlu1 %v3287_v42  ;;  %v2759_v60 = vpop.permute.xlu0 %1088 }
 0x1fc   :  { %1277 = vperm.xlu1 %1804, %v1846_v56  }
 0x1fd   :  { %v2764_v57 = vpop.permute.xlu1 %931 }
 0x1ff   :  { %v2766_v29 = vpop.permute.xlu0 %1121 }
 0x200   :  { %1805 = vset.pattern.permute.xlu1 %v3254_v51  ;;  %v1330_v51 = vld [vmem:[%s3176_s2 + $0x30] sm:$0xff] }
 0x201   :  { %825 = vperm.xlu1 %1805, %v2772_v28   ;;  %1673 = vmatprep.subr.mxu0 %v1330_v51  ;;  %v3326_v28 = vld [vmem:[#allocation12_spill] sm:$0xff] }
 0x202   :  { %v2775_v6 = vpop.permute.xlu1 %1085  ;;  %1674 = vmatpush3.msra.mxu0 %v1330_v51  ;;  %v1325_v51 = vld [vmem:[%s3176_s2 + $0x8] sm:$0xff]  ;;  %v113_v5 = vsel %vm65_vm2, %v3326_v28, 0.0 }
 0x203   :  { %3318 = vst [vmem:[#allocation16_spill] sm:$0xff] %v2775_v6  ;;  %v2777_v16 = vpop.permute.xlu0 %1091  ;;  %1675 = vmatprep.subr.mxu0 %v1329_v54  ;;  %v3334_v6 = vld [vmem:[#allocation76_spill] sm:$0xff] }
 0x204   :  { %1676 = vmatpush3.msra.mxu0 %v1329_v54  ;;  %vm553_vm7 = vcmp.eq.s32.totalorder %v2428_v38, %v3334_v6 }
 0x205   :  { %1806 = vset.pattern.permute.xlu1 %v3270_v2  ;;  %1677 = vmatprep.subr.mxu0 %v1328_v34 }
 0x206   :  { %977 = vperm.xlu1 %1806, %v2789_v0   ;;  %1678 = vmatpush3.msra.mxu0 %v1328_v34  ;;  %v2820_v34 = vld [vmem:[%s3174_s0 + $0x10] sm:$0xff] }
 0x207   :  { %v2792_v3 = vpop.permute.xlu1 %780  ;;  %v2794_v18 = vpop.permute.xlu0 %1129  ;;  %1679 = vmatprep.subr.mxu0 %v1327_v35 }
 0x208   :  { %1680 = vmatpush3.msra.mxu0 %v1327_v35  ;;  %vm793_vm10 = vcmp.eq.s32.totalorder %v2428_v38, %v2792_v3  ;;  %v3340_v3 = vld [vmem:[#allocation24_spill] sm:$0xff] }
 0x209   :  { %1681 = vmatprep.subr.mxu0 %v1326_v45 }
 0x20a   :  { %1807 = vset.pattern.permute.xlu1 %v3282_v61  ;;  %1682 = vmatpush3.msra.mxu0 %v1326_v45 }
 0x20b   :  { %1017 = vperm.xlu1 %1807, %v2646_v25   ;;  %v1098_v41 = vpop.permute.xlu0 %1097  ;;  %1683 = vmatprep.subr.mxu0 %v1325_v51 }
 0x20c   :  { %v2807_v56 = vpop.permute.xlu1 %934  ;;  %vm1112_vm0 = vcmp.eq.s32.totalorder %v2428_v38, %v1098_v41  ;;  %1684 = vmatpush3.msra.mxu0 %v1325_v51 }
 0x20d   :  { %1685 = vmatprep.subr.mxu0 %v1324_v43 }
 0x20e   :  { %1686 = vmatpush3.msra.mxu0 %v1324_v43  ;;  %v3322_v43 = vld [vmem:[#allocation22_spill] sm:$0xff] }
 0x20f   :  { %1808 = vset.pattern.permute.xlu1 %v3193_v21  ;;  %v1134_v54 = vpop.permute.xlu0 %1133  ;;  %v3321_v21 = vld [vmem:[#allocation17_spill] sm:$0xff] }
 0x210   :  { %1171 = vperm.xlu1 %1808, %v2820_v34   ;;  %v2823_v41 = vpop.permute.xlu1 %965  ;;  %v2825_v35 = vsel %vm1112_vm0, %v1134_v54, 0.0  ;;  %vm153_vm1 = vcmp.eq.s32.totalorder %v2428_v38, %v3321_v21  ;;  %v3327_v21 = vld [vmem:[#allocation33_spill] sm:$0xff] }
 0x211   :  { %3319 = vst [vmem:[#allocation21_spill] sm:$0xff] %v2825_v35  ;;  %v193_v46 = vsel %vm153_vm1, %v3322_v43, 0.0  ;;  %v3328_v35 = vmov 14   ;;  %v3329_v43 = vld [vmem:[#allocation41_spill] sm:$0xff]  ;;  %vm950_vm1 = vcmp.eq.s32.totalorder %v2428_v38, %v2764_v57 }
 0x212   :  { %v201_v22 = vadd.f32 %v193_v46, %v113_v5 }
 0x214   :  { %1809 = vset.pattern.permute.xlu1 %v3287_v42 }
 0x215   :  { %1281 = vperm.xlu1 %1809, %v2689_v31   ;;  %v2832_v45 = vpop.permute.xlu1 %1117  ;;  %v3324_v31 = vld [vmem:[#allocation28_spill] sm:$0xff] }
 0x216   :  { %3320 = vst [vmem:[#allocation5_spill] sm:$0xff] %v2832_v45  ;;  %vm233_vm3 = vcmp.eq.s32.totalorder %v2428_v38, %v3324_v31  ;;  %v3331_v31 = vld [vmem:[#allocation58_spill] sm:$0xff] }
 0x217   :  { %v273_v37 = vsel %vm233_vm3, %v3327_v21, 0.0  ;;  %vm473_vm6 = vcmp.eq.s32.totalorder %v2428_v38, %v3331_v31  ;;  %v3333_v21 = vld [vmem:[#allocation63_spill] sm:$0xff]  ;;  %v3337_v31 = vld [vmem:[#allocation85_spill] sm:$0xff] }
 0x218   :  { %v281_v44 = vadd.f32 %v273_v37, %v201_v22  ;;  %v513_v45 = vsel %vm473_vm6, %v3333_v21, 0.0  ;;  %v3335_v37 = vld [vmem:[#allocation80_spill] sm:$0xff]  ;;  %v3336_v22 = vld [vmem:[#allocation83_spill] sm:$0xff] }
 0x219   :  { %1810 = vset.pattern.permute.xlu1 %v3279_v33  ;;  %v3325_v33 = vld [vmem:[#allocation36_spill] sm:$0xff]  ;;  %vm633_vm8 = vcmp.eq.s32.totalorder %v2428_v38, %v3335_v37  ;;  %v3338_v21 = vld [vmem:[#allocation19_spill] sm:$0xff] }
 0x21a   :  { %901 = vperm.xlu1 %1810, %v2719_v14   ;;  %v818_v54 = vpop.permute.xlu1 %817  ;;  %vm313_vm4 = vcmp.eq.s32.totalorder %v2428_v38, %v3325_v33  ;;  %v3332_v33 = vld [vmem:[#allocation57_spill] sm:$0xff]  ;;  %vm155_vm11 = vcmp.eq.s32.totalorder %v2428_v38, %v3338_v21 }
 0x21b   :  { %v353_v32 = vsel %vm313_vm4, %v3329_v43, 0.0  ;;  %v433_v25 = vsel %vm393_vm5, %v3332_v33, 0.0  ;;  %v593_v43 = vsel %vm553_vm7, %v3336_v22, 0.0  ;;  %v753_v33 = vsel %vm713_vm9, %v2746_v27, 0.0  ;;  %v3339_v27 = vld [vmem:[#allocation8_spill] sm:$0xff] }
 0x21c   :  { %v361_v28 = vadd.f32 %v353_v32, %v281_v44  ;;  %v673_v44 = vsel %vm633_vm8, %v3337_v31, 0.0  ;;  %vm67_vm14 = vcmp.eq.s32.totalorder %v2428_v38, %v3339_v27  ;;  %v3342_v31 = vld [vmem:[#allocation30_spill] sm:$0xff]  ;;  %v3347_v27 = vld [vmem:[#allocation60_spill] sm:$0xff]  ;;  %vm871_vm9 = vcmp.eq.s32.totalorder %v2428_v38, %v2708_v15 }
 0x21d   :  { %vm235_vm15 = vcmp.eq.s32.totalorder %v2428_v38, %v3342_v31  ;;  %vm475_vm3 = vcmp.eq.s32.totalorder %v2428_v38, %v3347_v27  ;;  %v3349_v31 = vld [vmem:[#allocation65_spill] sm:$0xff] }
 0x21e   :  { %1811 = vset.pattern.permute.xlu1 %v3282_v61  ;;  %v441_v46 = vadd.f32 %v433_v25, %v361_v28  ;;  %v833_v28 = vsel %vm793_vm10, %v818_v54, 0.0  ;;  %v195_v54 = vsel %vm155_vm11, %v3340_v3, 0.0 }
 0x21f   :  { %1020 = vperm.xlu1 %1811, %v2730_v58   ;;  %v2840_v51 = vpop.permute.xlu1 %969 }
 0x220   :  { %v521_v53 = vadd.f32 %v513_v45, %v441_v46 }
 0x222   :  { %v601_v32 = vadd.f32 %v593_v43, %v521_v53  ;;  %v3341_v43 = vld [vmem:[#allocation13_spill] sm:$0xff] }
 0x223   :  { %1812 = vset.pattern.permute.xlu1 %v3328_v35  ;;  %v115_v53 = vsel %vm67_vm14, %v3341_v43, 0.0  ;;  %vm1031_vm14 = vcmp.eq.s32.totalorder %v2428_v38, %v2722_v36 }
 0x224   :  { %1174 = vperm.xlu1 %1812, %v2743_v59   ;;  %v1012_v26 = vpop.permute.xlu1 %1011  ;;  %v681_v6 = vadd.f32 %v673_v44, %v601_v32  ;;  %v275_v32 = vsel %vm235_vm15, %v3343_v13, 0.0 }
 0x225   :  { %vm1030_vm4 = vcmp.eq.s32.totalorder %v2428_v38, %v1012_v26 }
 0x226   :  { %v761_v45 = vadd.f32 %v753_v33, %v681_v6  ;;  %v203_v6 = vadd.f32 %v195_v54, %v115_v53 }
 0x228   :  { %1205 = vperm.xlu1 %1812, %v2753_v24   ;;  %v841_v37 = vadd.f32 %v833_v28, %v761_v45  ;;  %v990_v28 = vsel %vm950_vm1, %v2823_v41, 0.0  ;;  %v283_v21 = vadd.f32 %v275_v32, %v203_v6  ;;  %v3348_v41 = vld [vmem:[#allocation59_spill] sm:$0xff]  ;;  %v3350_v32 = vld [vmem:[#allocation78_spill] sm:$0xff]  ;;  %vm1109_vm1 = vcmp.eq.s32.totalorder %v2428_v38, %v2759_v60 }
 0x229   :  { %v2861_v5 = vpop.permute.xlu1 %1165  ;;  %v998_v3 = vadd.f32 %v990_v28, %v2724_v55  ;;  %vm555_vm5 = vcmp.eq.s32.totalorder %v2428_v38, %v3350_v32  ;;  %v3352_v55 = vld [vmem:[#allocation84_spill] sm:$0xff]  ;;  %v3353_v6 = vld [vmem:[#allocation87_spill] sm:$0xff] }
 0x22c   :  { %1814 = vset.pattern.permute.xlu1 %v3270_v2 }
 0x22d   :  { %943 = vperm.xlu1 %1814, %v2630_v11  }
 0x22e   :  { %v707_v25 = vpop.permute.xlu1 %706 }
 0x22f   :  { %vm715_vm7 = vcmp.eq.s32.totalorder %v2428_v38, %v707_v25  ;;  %v3357_v25 = vld [vmem:[#allocation27_spill] sm:$0xff] }
 0x230   :  { %vm234_vm11 = vcmp.eq.s32.totalorder %v2428_v38, %v3357_v25  ;;  %v3369_v25 = vld [vmem:[#allocation10_spill] sm:$0xff] }
 0x231   :  { %1815 = vset.pattern.permute.xlu1 %v3282_v61 }
 0x232   :  { %1057 = vperm.xlu1 %1815, %v2789_v0  }
 0x233   :  { %v861_v46 = vpop.permute.xlu1 %860 }
 0x234   :  { %vm873_vm12 = vcmp.eq.s32.totalorder %v2428_v38, %v861_v46  ;;  %v3345_v46 = vld [vmem:[#allocation43_spill] sm:$0xff] }
 0x235   :  { %v913_v62 = vsel %vm873_vm12, %v2585_v8, 0.0  ;;  %v3344_v8 = vld [vmem:[#allocation38_spill] sm:$0xff]  ;;  %vm951_vm12 = vcmp.eq.s32.totalorder %v2428_v38, %v2807_v56 }
 0x236   :  { %v2887_v22 = vadd.f32 %v913_v62, %v841_v37  ;;  %1816 = vset.pattern.permute.xlu1 %v3328_v35  ;;  %vm315_vm0 = vcmp.eq.s32.totalorder %v2428_v38, %v3344_v8  ;;  %v3346_v62 = vld [vmem:[#allocation52_spill] sm:$0xff]  ;;  %v3351_v8 = vld [vmem:[#allocation82_spill] sm:$0xff]  ;;  %v991_v15 = vsel %vm951_vm12, %v2840_v51, 0.0 }
 0x237   :  { %1209 = vperm.xlu1 %1816, %v2670_v4   ;;  %v894_v44 = vpop.permute.xlu1 %893  ;;  %v355_v37 = vsel %vm315_vm0, %v3345_v46, 0.0  ;;  %vm395_vm2 = vcmp.eq.s32.totalorder %v2428_v38, %v3346_v62  ;;  %vm635_vm6 = vcmp.eq.s32.totalorder %v2428_v38, %v3351_v8  ;;  %v3354_v46 = vmov 13   ;;  %v3362_v56 = vld [vmem:[#allocation46_spill] sm:$0xff] }
 0x238   :  { %v912_v33 = vsel %vm872_vm13, %v894_v44, 0.0  ;;  %v363_v43 = vadd.f32 %v355_v37, %v283_v21  ;;  %v515_v44 = vsel %vm475_vm3, %v3349_v31, 0.0  ;;  %v675_v28 = vsel %vm635_vm6, %v3353_v6, 0.0  ;;  %v3359_v31 = vld [vmem:[#allocation23_spill] sm:$0xff] }
 0x239   :  { %v920_v45 = vadd.f32 %v912_v33, %v2543_v17  ;;  %v435_v17 = vsel %vm395_vm2, %v3348_v41, 0.0  ;;  %v3356_v41 = vld [vmem:[#allocation18_spill] sm:$0xff]  ;;  %vm394_vm0 = vcmp.eq.s32.totalorder %v2428_v38, %v3362_v56 }
 0x23a   :  { %v443_v13 = vadd.f32 %v435_v17, %v363_v43  ;;  %vm154_vm10 = vcmp.eq.s32.totalorder %v2428_v38, %v3356_v41  ;;  %v911_v17 = vsel %vm871_vm9, %v2756_v19, 0.0  ;;  %v3368_v41 = vld [vmem:[#allocation68_spill] sm:$0xff]  ;;  %vm634_vm9 = vcmp.eq.s32.totalorder %v2428_v38, %v2460_v48 }
 0x23b   :  { %1817 = vset.pattern.permute.xlu1 %v3287_v42  ;;  %v919_v19 = vadd.f32 %v911_v17, %v2660_v40 }
 0x23c   :  { %1251 = vperm.xlu1 %1817, %v2820_v34   ;;  %v1046_v57 = vpop.permute.xlu1 %1045  ;;  %v595_v34 = vsel %vm555_vm5, %v3352_v55, 0.0  ;;  %v523_v33 = vadd.f32 %v515_v44, %v443_v13  ;;  %v194_v44 = vsel %vm154_vm10, %v3359_v31, 0.0  ;;  %v3360_v13 = vld [vmem:[#allocation32_spill] sm:$0xff]  ;;  %vm554_vm5 = vcmp.eq.s32.totalorder %v2428_v38, %v3368_v41  ;;  %v3382_v41 = vld [vmem:[#allocation77_spill] sm:$0xff] }
 0x23d   :  { %v1070_v54 = vsel %vm1030_vm4, %v1046_v57, 0.0  ;;  %v3355_v57 = vld [vmem:[#allocation9_spill] sm:$0xff]  ;;  %v274_v32 = vsel %vm234_vm11, %v3360_v13, 0.0  ;;  %v999_v51 = vadd.f32 %v991_v15, %v919_v19  ;;  %v3373_v13 = vld [vmem:[#allocation34_spill] sm:$0xff] }
 0x23e   :  { %v2911_v53 = vadd.f32 %v1070_v54, %v998_v3  ;;  %v603_v21 = vadd.f32 %v595_v34, %v523_v33  ;;  %vm66_vm8 = vcmp.eq.s32.totalorder %v2428_v38, %v3355_v57  ;;  %v3361_v34 = vld [vmem:[#allocation39_spill] sm:$0xff]  ;;  %v3367_v57 = vld [vmem:[#allocation64_spill] sm:$0xff] }
 0x23f   :  { %vm314_vm15 = vcmp.eq.s32.totalorder %v2428_v38, %v3361_v34  ;;  %vm474_vm4 = vcmp.eq.s32.totalorder %v2428_v38, %v3367_v57  ;;  %v3375_v34 = vld [vmem:[#allocation29_spill] sm:$0xff] }
 0x240   :  { %1818 = vset.pattern.permute.xlu1 %v3270_v2  ;;  %v683_v37 = vadd.f32 %v675_v28, %v603_v21  ;;  %v3365_v28 = vld [vmem:[#allocation15_spill] sm:$0xff]  ;;  %v3366_v21 = vld [vmem:[#allocation53_spill] sm:$0xff] }
 0x241   :  { %981 = vperm.xlu1 %1818, %v2719_v14   ;;  %v2921_v26 = vpop.permute.xlu1 %1168  ;;  %vm148_vm3 = vcmp.eq.s32.totalorder %v2428_v38, %v3365_v28  ;;  %v3379_v28 = vld [vmem:[#allocation48_spill] sm:$0xff] }
 0x242   :  { %vm1189_vm6 = vcmp.eq.s32.totalorder %v2428_v38, %v2921_v26  ;;  %v674_v26 = vsel %vm634_vm9, %v2488_v9, 0.0 }
 0x245   :  { %1819 = vset.pattern.permute.xlu1 %v3354_v46 }
 0x246   :  { %1100 = vperm.xlu1 %1819, %v2730_v58   ;;  %v746_v62 = vpop.permute.xlu1 %745 }
 0x247   :  { %v755_v27 = vsel %vm715_vm7, %v746_v62, 0.0  ;;  %v1149_v62 = vsel %vm1109_vm1, %v2766_v29, 0.0  ;;  %vm948_vm1 = vcmp.eq.s32.totalorder %v2428_v38, %v2605_v49 }
 0x248   :  { %v2927_v2 = vadd.f32 %v755_v27, %v683_v37  ;;  %v434_v37 = vsel %vm394_vm0, %v3366_v21, 0.0  ;;  %vm788_vm0 = vcmp.eq.s32.totalorder %v2428_v38, %v2547_v20 }
 0x24a   :  { %1820 = vset.pattern.permute.xlu1 %v3287_v42 }
 0x24b   :  { %1254 = vperm.xlu1 %1820, %v2743_v59   ;;  %v2931_v3 = vpop.permute.xlu1 %783  ;;  %v3358_v59 = vld [vmem:[#allocation14_spill] sm:$0xff] }
 0x24c   :  { %v114_v43 = vsel %vm66_vm8, %v3358_v59, 0.0  ;;  %vm308_vm8 = vcmp.eq.s32.totalorder %v2428_v38, %v3373_v13 }
 0x24d   :  { %v202_v55 = vadd.f32 %v194_v44, %v114_v43  ;;  %v3371_v43 = vld [vmem:[#allocation20_spill] sm:$0xff]  ;;  %v1157_v44 = vadd.f32 %v1149_v62, %v2713_v12  ;;  %v3380_v62 = vld [vmem:[#allocation71_spill] sm:$0xff] }
 0x24e   :  { %v188_v31 = vsel %vm148_vm3, %v3371_v43, 0.0  ;;  %vm548_vm12 = vcmp.eq.s32.totalorder %v2428_v38, %v3380_v62  ;;  %v3389_v62 = vld [vmem:[#allocation55_spill] sm:$0xff] }
 0x24f   :  { %1285 = vperm.xlu1 %1820, %v2753_v24   ;;  %v282_v33 = vadd.f32 %v274_v32, %v202_v55  ;;  %v3374_v32 = vld [vmem:[#allocation75_spill] sm:$0xff] }
 0x250   :  { %v938_v54 = vpop.permute.xlu1 %937  ;;  %v594_v19 = vsel %vm554_vm5, %v3374_v32, 0.0  ;;  %v828_v32 = vsel %vm788_vm0, %v2554_v10, 0.0 }
 0x251   :  { %vm952_vm13 = vcmp.eq.s32.totalorder %v2428_v38, %v938_v54  ;;  %v3370_v54 = vld [vmem:[#allocation69_spill] sm:$0xff] }
 0x252   :  { %v992_v24 = vsel %vm952_vm13, %v2649_v23, 0.0  ;;  %v3363_v23 = vld [vmem:[#allocation44_spill] sm:$0xff]  ;;  %v514_v59 = vsel %vm474_vm4, %v3370_v54, 0.0  ;;  %vm628_vm13 = vcmp.eq.s32.totalorder %v2428_v38, %v3382_v41  ;;  %vm1110_vm4 = vcmp.eq.s32.totalorder %v2428_v38, %v2777_v16 }
 0x253   :  { %v2954_v8 = vadd.f32 %v992_v24, %v920_v45  ;;  %1822 = vset.pattern.permute.xlu1 %v3282_v61  ;;  %v354_v36 = vsel %vm314_vm15, %v3363_v23, 0.0  ;;  %v3364_v45 = vld [vmem:[#allocation6_spill] sm:$0xff]  ;;  %v3372_v24 = vld [vmem:[#allocation25_spill] sm:$0xff]  ;;  %vm708_vm15 = vcmp.eq.s32.totalorder %v2428_v38, %v2503_v39 }
 0x254   :  { %1023 = vperm.xlu1 %1822, %v2630_v11   ;;  %vm60_vm2 = vcmp.eq.s32.totalorder %v2428_v38, %v3364_v45  ;;  %v362_v60 = vadd.f32 %v354_v36, %v282_v33  ;;  %vm228_vm7 = vcmp.eq.s32.totalorder %v2428_v38, %v3372_v24  ;;  %v3376_v36 = vld [vmem:[#allocation40_spill] sm:$0xff]  ;;  %v3377_v33 = vld [vmem:[#allocation45_spill] sm:$0xff] }
 0x255   :  { %v1050_v40 = vpop.permute.xlu1 %1049  ;;  %v108_v17 = vsel %vm60_vm2, %v3369_v25, 0.0  ;;  %vm388_vm10 = vcmp.eq.s32.totalorder %v2428_v38, %v3377_v33  ;;  %v3015_v25 = vld [vmem:[%s3174_s0 + $0x38] sm:$0xff]  ;;  %v1851_v39 = vld [vmem:[%s3175_s1 + $0x20] sm:$0xff]  ;;  %vm1028_vm2 = vcmp.eq.s32.totalorder %v2428_v38, %v2693_v47 }
 0x256   :  { %v1071_v6 = vsel %vm1031_vm14, %v1050_v40, 0.0  ;;  %v442_v29 = vadd.f32 %v434_v37, %v362_v60  ;;  %v196_v23 = vadd.f32 %v188_v31, %v108_v17  ;;  %v428_v21 = vsel %vm388_vm10, %v3379_v28, 0.0  ;;  %v3381_v60 = vld [vmem:[#allocation66_spill] sm:$0xff]  ;;  %v3022_v31 = vpop.permute.xlu0 %1141  ;;  %v3385_v47 = vld [vmem:[#allocation5_spill] sm:$0xff] }
 0x257   :  { %v2971_v27 = vadd.f32 %v1071_v6, %v999_v51  ;;  %v348_v51 = vsel %vm308_vm8, %v3376_v36, 0.0  ;;  %v3378_v6 = vld [vmem:[#allocation54_spill] sm:$0xff]  ;;  %vm794_vm14 = vcmp.eq.s32.totalorder %v2428_v38, %v2931_v3  ;;  %v1068_v10 = vsel %vm1028_vm2, %v2733_v7, 0.0 }
 0x258   :  { %1823 = vset.pattern.permute.xlu1 %v3354_v46  ;;  %v522_v56 = vadd.f32 %v514_v59, %v442_v29  ;;  %vm468_vm11 = vcmp.eq.s32.totalorder %v2428_v38, %v3378_v6  ;;  %v3383_v17 = vld [vmem:[#allocation70_spill] sm:$0xff]  ;;  %vm1332_vm8 = vcmask 523264  }
 0x259   :  { %1137 = vperm.xlu1 %1823, %v2789_v0   ;;  %v268_v0 = vsel %vm228_vm7, %v3375_v34, 0.0  ;;  %v508_v57 = vsel %vm468_vm11, %v3381_v60, 0.0  ;;  %v588_v54 = vsel %vm548_vm12, %v3383_v17, 0.0 }
 0x25a   :  { %v1202_v15 = vpop.permute.xlu1 %1201  ;;  %v602_v40 = vadd.f32 %v594_v19, %v522_v56  ;;  %v276_v45 = vadd.f32 %v268_v0, %v196_v23  ;;  %v3035_v19 = vpop.permute.xlu0 %1145  ;;  %v3384_v56 = vld [vmem:[#allocation16_spill] sm:$0xff] }
 0x25b   :  { %v1229_v55 = vsel %vm1189_vm6, %v1202_v15, 0.0  ;;  %vm1108_vm5 = vcmp.eq.s32.totalorder %v2428_v38, %v3384_v56  ;;  %vm1188_vm6 = vcmp.eq.s32.totalorder %v2428_v38, %v2861_v5 }
 0x25c   :  { %v2993_v12 = vadd.f32 %v1229_v55, %v1157_v44  ;;  %v682_v37 = vadd.f32 %v674_v26, %v602_v40  ;;  %v356_v9 = vadd.f32 %v348_v51, %v276_v45  ;;  %v668_v44 = vsel %vm628_vm13, %v2468_v52, 0.0  ;;  %v3386_v40 = vld [vmem:[#allocation56_spill] sm:$0xff] }
 0x25d   :  { %1824 = vset.pattern.permute.xlu1 %v3287_v42  ;;  %v1148_v7 = vsel %vm1108_vm5, %v3385_v47, 0.0 }
 0x25e   :  { %1289 = vperm.xlu1 %1824, %v2670_v4   ;;  %v436_v4 = vadd.f32 %v428_v21, %v356_v9  ;;  %v762_v59 = vadd.f32 %v2495_v30, %v682_v37  ;;  %v748_v30 = vsel %vm708_vm15, %v2539_v63, 0.0  ;;  %v988_v63 = vsel %vm948_vm1, %v2634_v50, 0.0  ;;  %v1198_v50 = vpop.permute.xlu0 %1197 }
 0x25f   :  { %v3003_v48 = vpop.permute.xlu1 %1245  ;;  %v1228_v26 = vsel %vm1188_vm6, %v1198_v50, 0.0 }
 0x260   :  { %vm1268_vm7 = vcmp.eq.s32.totalorder %v2428_v38, %v3003_v48  ;;  %v3388_v48 = vld [vmem:[#allocation49_spill] sm:$0xff] }
 0x262   :  { %1825 = vset.pattern.permute.xlu1 %v3282_v61  ;;  %v516_v61 = vadd.f32 %v508_v57, %v436_v4 }
 0x263   :  { %1026 = vperm.xlu1 %1825, %v3015_v25  }
 0x264   :  { %v822_v43 = vpop.permute.xlu1 %821  ;;  %v596_v24 = vadd.f32 %v588_v54, %v516_v61  ;;  %v3391_v54 = vld [vmem:[#allocation21_spill] sm:$0xff] }
 0x265   :  { %v834_v29 = vsel %vm794_vm14, %v822_v43, 0.0  ;;  %v3392_v43 = vld [vmem:[#allocation89_spill] sm:$0xff] }
 0x266   :  { %v3025_v15 = vadd.f32 %v834_v29, %v762_v59  ;;  %v676_v3 = vadd.f32 %v668_v44, %v596_v24  ;;  %vm1269_vm12 = vcmp.eq.s32.totalorder %v2428_v38, %v3392_v43 }
 0x267   :  { %1826 = vset.pattern.permute.xlu1 %v3328_v35 }
 0x268   :  { %1180 = vperm.xlu1 %1826, %v2730_v58   ;;  %v756_v52 = vadd.f32 %v748_v30, %v676_v3  ;;  %v3394_v3 = vld [vmem:[#allocation81_spill] sm:$0xff] }
 0x269   :  { %v941_v13 = vpop.permute.xlu1 %940 }
 0x26a   :  { %v836_v55 = vadd.f32 %v828_v32, %v756_v52  ;;  %vm953_vm10 = vcmp.eq.s32.totalorder %v2428_v38, %v941_v13  ;;  %v1465_v13 = vld [vmem:[%s3177_s3 + $0x18] sm:$0xff]  ;;  %v1464_v32 = vld [vmem:[%s3177_s3 + $0x10] sm:$0xff] }
 0x26c   :  { %1213 = vperm.xlu1 %1826, %v1851_v39   ;;  %v916_v20 = vadd.f32 %v2572_v1, %v836_v55 }
 0x26e   :  { %v1095_v34 = vpop.permute.xlu1 %1094  ;;  %v996_v49 = vadd.f32 %v988_v63, %v916_v20 }
 0x26f   :  { %vm1111_vm3 = vcmp.eq.s32.totalorder %v2428_v38, %v1095_v34 }
 0x270   :  { %v1151_v0 = vsel %vm1111_vm3, %v2794_v18, 0.0  ;;  %1828 = vset.pattern.permute.xlu1 %v3354_v46  ;;  %v1076_v23 = vadd.f32 %v1068_v10, %v996_v49 }
 0x271   :  { %v3057_v1 = vadd.f32 %v1151_v0, %v2971_v27  ;;  %1103 = vperm.xlu1 %1828, %v2630_v11  }
 0x272   :  { %v1126_v16 = vpop.permute.xlu1 %1125  ;;  %v1156_v51 = vadd.f32 %v1148_v7, %v1076_v23 }
 0x273   :  { %v1150_v18 = vsel %vm1110_vm4, %v1126_v16, 0.0 }
 0x274   :  { %v3062_v36 = vadd.f32 %v1150_v18, %v2911_v53  ;;  %v1236_v5 = vadd.f32 %v1228_v26, %v1156_v51  ;;  %v3387_v53 = vld [vmem:[#allocation88_spill] sm:$0xff]  ;;  %v1463_v51 = vld [vmem:[%s3177_s3 + $0x8] sm:$0xff] }
 0x275   :  { %1829 = vset.pattern.permute.xlu1 %v3287_v42  ;;  %vm795_vm9 = vcmp.eq.s32.totalorder %v2428_v38, %v3387_v53 }
 0x276   :  { %1257 = vperm.xlu1 %1829, %v3386_v40  }
 0x277   :  { %v1278_v27 = vpop.permute.xlu1 %1277 }
 0x278   :  { %v1308_v45 = vsel %vm1268_vm7, %v1278_v27, 0.0 }
 0x279   :  { %v1316_v33 = vadd.f32 %v1308_v45, %v1236_v5 }
 0x27a   :  { %1830 = vset.pattern.permute.xlu1 %v3354_v46 }
 0x27b   :  { %1106 = vperm.xlu1 %1830, %v3015_v25   ;;  %1687 = vmatprep.mubr.msk.f32.mxu0 %vm1332_vm8, %v1316_v33 }
 0x27c   :  { %v826_v6 = vpop.permute.xlu1 %825 }
 0x27d   :  { %v835_v28 = vsel %vm795_vm9, %v826_v6, 0.0 }
 0x27e   :  { %v843_v21 = vadd.f32 %v835_v28, %v2927_v2  ;;  %v3390_v2 = vld [vmem:[#allocation62_spill] sm:$0xff] }
 0x27f   :  { %1831 = vset.pattern.permute.xlu1 %v3287_v42 }
 0x280   :  { %v923_v37 = vadd.f32 %v3388_v48, %v843_v21  ;;  %1260 = vperm.xlu1 %1831, %v2730_v58   ;;  %v1178_v48 = vpop.permute.xlu0 %1177 }
 0x281   :  { %v978_v46 = vpop.permute.xlu1 %977  ;;  %vm1192_vm4 = vcmp.eq.s32.totalorder %v2428_v38, %v1178_v48 }
 0x282   :  { %v993_v9 = vsel %vm953_vm10, %v978_v46, 0.0  ;;  %v3079_v60 = vadd.f32 %v3389_v62, %v923_v37 }
 0x283   :  { %v1001_v57 = vadd.f32 %v993_v9, %v2887_v22 }
 0x284   :  { %1293 = vperm.xlu1 %1831, %v1851_v39   ;;  %v1218_v9 = vpop.permute.xlu0 %1217 }
 0x286   :  { %v1018_v4 = vpop.permute.xlu1 %1017 }
 0x287   :  { %vm1032_vm11 = vcmp.eq.s32.totalorder %v2428_v38, %v1018_v4 }
 0x288   :  { %v1072_v41 = vsel %vm1032_vm11, %v3390_v2, 0.0  ;;  %1833 = vset.pattern.permute.xlu1 %v3328_v35  ;;  %v3393_v35 = vld [vmem:[#allocation90_spill] sm:$0xff] }
 0x289   :  { %v1080_v17 = vadd.f32 %v1072_v41, %v2954_v8  ;;  %1183 = vperm.xlu1 %1833, %v2630_v11   ;;  %vm874_vm13 = vcmp.eq.s32.totalorder %v2428_v38, %v3393_v35 }
 0x28b   :  { %v1172_v58 = vpop.permute.xlu1 %1171  ;;  %v3088_v59 = vadd.f32 %v3391_v54, %v1080_v17 }
 0x28c   :  { %vm1190_vm0 = vcmp.eq.s32.totalorder %v2428_v38, %v1172_v58 }
 0x28d   :  { %1186 = vperm.xlu1 %1833, %v3015_v25  }
 0x290   :  { %v1282_v22 = vpop.permute.xlu1 %1281 }
 0x291   :  { %v1309_v61 = vsel %vm1269_vm12, %v1282_v22, 0.0  ;;  %1221 = vperm.xlu1 %1833, %v2719_v14   ;;  %v1469_v14 = vld [vmem:[%s3177_s3 + $0x38] sm:$0xff] }
 0x292   :  { %v1317_v29 = vadd.f32 %v1309_v61, %v2993_v12  ;;  %v1468_v12 = vld [vmem:[%s3177_s3 + $0x30] sm:$0xff]  ;;  %1699 = vmatprep.subr.mxu1 %v1469_v14 }
 0x293   :  { %1700 = vmatpush3.msra.mxu1 %v1469_v14 }
 0x294   :  { %1688 = vmatmul.mubr.msk.f32.vlgmr.msra.gmra.mxu0 %vm1332_vm8, %v1317_v29  ;;  %1701 = vmatprep.subr.mxu1 %v1468_v12 }
 0x295   :  { %1835 = vset.pattern.permute.xlu1 %v3287_v42  ;;  %v902_v8 = vpop.permute.xlu1 %901  ;;  %1702 = vmatpush3.msra.mxu1 %v1468_v12 }
 0x296   :  { %v914_v44 = vsel %vm874_vm13, %v902_v8, 0.0  ;;  %1263 = vperm.xlu1 %1835, %v2630_v11   ;;  %v1467_v11 = vld [vmem:[%s3177_s3 + $0x28] sm:$0xff] }
 0x297   :  { %v922_v24 = vadd.f32 %v914_v44, %v3025_v15  ;;  %1703 = vmatprep.subr.mxu1 %v1467_v11 }
 0x298   :  { %1704 = vmatpush3.msra.mxu1 %v1467_v11 }
 0x29a   :  { %1266 = vperm.xlu1 %1835, %v3015_v25   ;;  %v1021_v30 = vpop.permute.xlu1 %1020  ;;  %v1466_v25 = vld [vmem:[%s3177_s3 + $0x20] sm:$0xff] }
 0x29b   :  { %1705 = vmatprep.subr.mxu1 %v1466_v25  ;;  %vm1033_vm14 = vcmp.eq.s32.totalorder %v2428_v38, %v1021_v30  ;;  %v3395_v30 = vld [vmem:[#allocation74_spill] sm:$0xff] }
 0x29c   :  { %1706 = vmatpush3.msra.mxu1 %v1466_v25 }
 0x29d   :  { %1707 = vmatprep.subr.mxu1 %v1465_v13 }
 0x29e   :  { %1305 = vperm.xlu1 %1835, %v3394_v3   ;;  %1708 = vmatpush3.msra.mxu1 %v1465_v13  ;;  %v3396_v13 = vld [vmem:[#allocation79_spill] sm:$0xff] }
 0x29f   :  { %v1175_v42 = vpop.permute.xlu1 %1174  ;;  %1709 = vmatprep.subr.mxu1 %v1464_v32 }
 0x2a0   :  { %1710 = vmatpush3.msra.mxu1 %v1464_v32  ;;  %vm1191_vm2 = vcmp.eq.s32.totalorder %v2428_v38, %v1175_v42 }
 0x2a1   :  { %1711 = vmatprep.subr.mxu1 %v1463_v51 }
 0x2a2   :  { %1712 = vmatpush3.msra.mxu1 %v1463_v51 }
 0x2a3   :  { %v1206_v15 = vpop.permute.xlu1 %1205 }
 0x2a4   :  { %v1230_v47 = vsel %vm1190_vm0, %v1206_v15, 0.0 }
 0x2a5   :  { %v1238_v7 = vadd.f32 %v1230_v47, %v3062_v36  ;;  %v1462_v36 = vld [vmem:[%s3177_s3] sm:$0xff]  ;;  %s1890_s3 = smov [#allocation2]  }
 0x2a6   :  { %1713 = vmatprep.subr.mxu1 %v1462_v36  ;;  %s1612_s30 = sshll.u32 %s1890_s3, 4  ;;  %s1613_s30 = int_to_ptr.vmem [resolvable:$true] %s1612_s30 }
 0x2a7   :  { %1714 = vmatpush3.msra.mxu1 %v1462_v36  ;;  %s1852_s5 = scalar_lea.vmem %s1613_s30, 1024  ;;  %p1857_p1 = scmp.lt.s32.totalorder %s1613_s30, %s1613_s30 }
 0x2a8   :  { %v944_v52 = vpop.permute.xlu1 %943  ;;  %p1853_p0 = scmp.ne.s32.totalorder %s1613_s30, %s1852_s5  ;;  %p1858_p2 = scmp.lt.s32.totalorder %s1852_s5, %s1852_s5 }
 0x2a9   :  { %vm954_vm15 = vcmp.eq.s32.totalorder %v2428_v38, %v944_v52 }
 0x2aa   :  { %p1859_p3 = por %p1858_p2, %p1857_p1 }
 0x2ac   :  { %p1860_p4 = pnand %p1859_p3, %p1853_p0 }
 0x2ad   :  { %v1058_v39 = vpop.permute.xlu1 %1057 }
 0x2ae   :  { %v1073_v55 = vsel %vm1033_vm14, %v1058_v39, 0.0 }
 0x2af   :  { %v1081_v63 = vadd.f32 %v1073_v55, %v1001_v57  ;;  %v1226_v57 = vpop.permute.xlu0 %1225 }
 0x2b2   :  { %v1210_v34 = vpop.permute.xlu1 %1209 }
 0x2b3   :  { %v1231_v5 = vsel %vm1191_vm2, %v1210_v34, 0.0  ;;  %v1298_v41 = vpop.permute.xlu0 %1297 }
 0x2b4   :  { %v1239_v27 = vadd.f32 %v1231_v5, %v3057_v1 }
 0x2b7   :  { %v1252_v20 = vpop.permute.xlu1 %1251  ;;  %v1302_v25 = vpop.permute.xlu0 %1301 }
 0x2b8   :  { %vm1270_vm1 = vcmp.eq.s32.totalorder %v2428_v38, %v1252_v20 }
 0x2bc   :  { %v982_v10 = vpop.permute.xlu1 %981 }
 0x2bd   :  { %v994_v0 = vsel %vm954_vm15, %v982_v10, 0.0 }
 0x2be   :  { %v3123_v49 = vadd.f32 %v994_v0, %v922_v24 }
 0x2c1   :  { %v1101_v56 = vpop.permute.xlu1 %1100 }
 0x2c2   :  { %vm1113_vm5 = vcmp.eq.s32.totalorder %v2428_v38, %v1101_v56 }
 0x2c6   :  { %v1255_v50 = vpop.permute.xlu1 %1254 }
 0x2c7   :  { %vm1271_vm3 = vcmp.eq.s32.totalorder %v2428_v38, %v1255_v50 }
 0x2ca   :  { %v1286_v16 = vpop.permute.xlu1 %1285 }
 0x2cb   :  { %v1310_v23 = vsel %vm1270_vm1, %v1286_v16, 0.0 }
 0x2cc   :  { %v1318_v18 = vadd.f32 %v1310_v23, %v1238_v7 }
 0x2ce   :  { %1690 = vmatprep.mubr.msk.f32.mxu0 %vm1332_vm8, %v1318_v18 }
 0x2cf   :  { %v1024_v26 = vpop.permute.xlu1 %1023 }
 0x2d0   :  { %vm1034_vm10 = vcmp.eq.s32.totalorder %v2428_v38, %v1024_v26 }
 0x2d4   :  { %v1138_v40 = vpop.permute.xlu1 %1137 }
 0x2d5   :  { %v1153_v1 = vsel %vm1113_vm5, %v1138_v40, 0.0 }
 0x2d6   :  { %v1161_v58 = vadd.f32 %v1153_v1, %v1081_v63 }
 0x2d9   :  { %v1290_v45 = vpop.permute.xlu1 %1289 }
 0x2da   :  { %v1311_v33 = vsel %vm1271_vm3, %v1290_v45, 0.0 }
 0x2db   :  { %v1319_v53 = vadd.f32 %v1311_v33, %v1239_v27 }
 0x2dd   :  { %1691 = vmatmul.mubr.msk.f32.gmra.mxu0 %vm1332_vm8, %v1319_v53 }
 0x2de   :  { %v1027_v6 = vpop.permute.xlu1 %1026 }
 0x2df   :  { %vm1035_vm13 = vcmp.eq.s32.totalorder %v2428_v38, %v1027_v6 }
 0x2e0   :  { %v1075_v32 = vsel %vm1035_vm13, %v3396_v13, 0.0 }
 0x2e1   :  { %v1083_v63 = vadd.f32 %v1075_v32, %v3079_v60 }
 0x2e3   :  { %v1181_v28 = vpop.permute.xlu1 %1180 }
 0x2e4   :  { %vm1193_vm6 = vcmp.eq.s32.totalorder %v2428_v38, %v1181_v28 }
 0x2e5   :  { %v1233_v17 = vsel %vm1193_vm6, %v1218_v9, 0.0 }
 0x2e6   :  { %v1241_v61 = vadd.f32 %v1233_v17, %v1161_v58 }
 0x2e7   :  { %v1214_v21 = vpop.permute.xlu1 %1213 }
 0x2e8   :  { %v1232_v2 = vsel %vm1192_vm4, %v1214_v21, 0.0 }
 0x2e9   :  { %v1240_v54 = vadd.f32 %v1232_v2, %v3088_v59  ;;  %v1074_v59 = vsel %vm1034_vm10, %v3395_v30, 0.0 }
 0x2ea   :  { %v1082_v3 = vadd.f32 %v1074_v59, %v3123_v49 }
 0x2ec   :  { %v1104_v37 = vpop.permute.xlu1 %1103 }
 0x2ed   :  { %vm1114_vm11 = vcmp.eq.s32.totalorder %v2428_v38, %v1104_v37 }
 0x2ee   :  { %v1154_v12 = vsel %vm1114_vm11, %v3022_v31, 0.0 }
 0x2ef   :  { %v1162_v11 = vadd.f32 %v1154_v12, %v1082_v3 }
 0x2f1   :  { %v1258_v46 = vpop.permute.xlu1 %1257 }
 0x2f2   :  { %vm1272_vm9 = vcmp.eq.s32.totalorder %v2428_v38, %v1258_v46 }
 0x2f6   :  { %v1107_v62 = vpop.permute.xlu1 %1106 }
 0x2f7   :  { %vm1115_vm14 = vcmp.eq.s32.totalorder %v2428_v38, %v1107_v62 }
 0x2f8   :  { %v1155_v39 = vsel %vm1115_vm14, %v3035_v19, 0.0 }
 0x2f9   :  { %v1163_v10 = vadd.f32 %v1155_v39, %v1083_v63 }
 0x2fb   :  { %v1261_v4 = vpop.permute.xlu1 %1260 }
 0x2fc   :  { %vm1273_vm7 = vcmp.eq.s32.totalorder %v2428_v38, %v1261_v4 }
 0x2fd   :  { %v1313_v43 = vsel %vm1273_vm7, %v1298_v41, 0.0 }
 0x2fe   :  { %v1321_v8 = vadd.f32 %v1313_v43, %v1241_v61 }
 0x2ff   :  { %v1294_v22 = vpop.permute.xlu1 %1293 }
 0x300   :  { %v1312_v29 = vsel %vm1272_vm9, %v1294_v22, 0.0 }
 0x301   :  { %v1320_v35 = vadd.f32 %v1312_v29, %v1240_v54 }
 0x303   :  { %1693 = vmatprep.mubr.msk.f32.mxu0 %vm1332_vm8, %v1320_v35 }
 0x304   :  { %v1184_v44 = vpop.permute.xlu1 %1183  ;;  %1694 = vmatmul.mubr.msk.f32.gmra.mxu0 %vm1332_vm8, %v1321_v8 }
 0x305   :  { %vm1194_vm12 = vcmp.eq.s32.totalorder %v2428_v38, %v1184_v44 }
 0x308   :  { %v1187_v24 = vpop.permute.xlu1 %1186 }
 0x309   :  { %vm1195_vm0 = vcmp.eq.s32.totalorder %v2428_v38, %v1187_v24 }
 0x30a   :  { %v1235_v20 = vsel %vm1195_vm0, %v1226_v57, 0.0 }
 0x30b   :  { %v1243_v0 = vadd.f32 %v1235_v20, %v1163_v10 }
 0x30c   :  { %v1222_v14 = vpop.permute.xlu1 %1221 }
 0x30d   :  { %v1234_v42 = vsel %vm1194_vm12, %v1222_v14, 0.0 }
 0x30e   :  { %v1242_v52 = vadd.f32 %v1234_v42, %v1162_v11 }
 0x311   :  { %v1264_v15 = vpop.permute.xlu1 %1263 }
 0x312   :  { %vm1274_vm15 = vcmp.eq.s32.totalorder %v2428_v38, %v1264_v15 }
 0x313   :  { %v1314_v31 = vsel %vm1274_vm15, %v1302_v25, 0.0 }
 0x314   :  { %v1322_v55 = vadd.f32 %v1314_v31, %v1242_v52 }
 0x315   :  { %v1267_v34 = vpop.permute.xlu1 %1266 }
 0x316   :  { %1696 = vmatprep.mubr.msk.f32.mxu0 %vm1332_vm8, %v1322_v55  ;;  %vm1275_vm1 = vcmp.eq.s32.totalorder %v2428_v38, %v1267_v34 }
 0x319   :  { %v1306_v49 = vpop.permute.xlu1 %1305 }
 0x31a   :  { %v1315_v56 = vsel %vm1275_vm1, %v1306_v49, 0.0 }
 0x31b   :  { %v1323_v50 = vadd.f32 %v1315_v56, %v1243_v0 }
 0x31d   :  { %1697 = vmatmul.mubr.msk.f32.gmra.mxu0 %vm1332_vm8, %v1323_v50 }
 0x354   :  { %v1689_v47 = vpop.f32.mrf.mxu0 }
 0x356   :  { %v1423_v7 = vpop.f32.mrf.mxu0 }
 0x357   :  { %1715 = vmatprep.mubr.msk.f32.mxu1 %vm1332_vm8, %v1423_v7 }
 0x358   :  { %1716 = vmatmul.mubr.msk.f32.vlgmr.msra.gmra.mxu1 %vm1332_vm8, %v1689_v47 }
 0x39d   :  { %v1692_v19 = vpop.f32.mrf.mxu0 }
 0x39f   :  { %v1433_v60 = vpop.f32.mrf.mxu0 }
 0x3a0   :  { %1718 = vmatprep.mubr.msk.f32.mxu1 %vm1332_vm8, %v1433_v60 }
 0x3a1   :  { %1719 = vmatmul.mubr.msk.f32.gmra.mxu1 %vm1332_vm8, %v1692_v19 }
 0x3c4   :  { %v1695_v16 = vpop.f32.mrf.mxu0 }
 0x3c6   :  { %v1443_v23 = vpop.f32.mrf.mxu0 }
 0x3c7   :  { %1721 = vmatprep.mubr.msk.f32.mxu1 %vm1332_vm8, %v1443_v23 }
 0x3c8   :  { %1722 = vmatmul.mubr.msk.f32.gmra.mxu1 %vm1332_vm8, %v1695_v16 }
 0x3dd   :  { %v1698_v38 = vpop.f32.mrf.mxu0 }
 0x3df   :  { %v1453_v18 = vpop.f32.mrf.mxu0 }
 0x3e0   :  { %1724 = vmatprep.mubr.msk.f32.mxu1 %vm1332_vm8, %v1453_v18 }
 0x3e1   :  { %1725 = vmatmul.mubr.msk.f32.gmra.mxu1 %vm1332_vm8, %v1698_v38 }
 0x418   :  { %v1717_v26 = vpop.f32.mrf.mxu1 }
 0x419   :  { %1600 = vst [vmem:[#allocation2 + $0x8] sm:$0xff] %v1717_v26 }
 0x41a   :  { %v1560_v51 = vpop.f32.mrf.mxu1 }
 0x41b   :  { %1599 = vst [vmem:[#allocation2] sm:$0xff] %v1560_v51 }
 0x461   :  { %v1720_v40 = vpop.f32.mrf.mxu1 }
 0x462   :  { %1602 = vst [vmem:[#allocation2 + $0x18] sm:$0xff] %v1720_v40 }
 0x463   :  { %v1570_v36 = vpop.f32.mrf.mxu1 }
 0x464   :  { %1601 = vst [vmem:[#allocation2 + $0x10] sm:$0xff] %v1570_v36 }
 0x488   :  { %v1723_v5 = vpop.f32.mrf.mxu1 }
 0x489   :  { %1604 = vst [vmem:[#allocation2 + $0x28] sm:$0xff] %v1723_v5 }
 0x48a   :  { %v1580_v27 = vpop.f32.mrf.mxu1 }
 0x48b   :  { %1603 = vst [vmem:[#allocation2 + $0x20] sm:$0xff] %v1580_v27 }
 0x4a1   :  { %v1726_v45 = vpop.f32.mrf.mxu1 }
 0x4a2   :  { %1606 = vst [vmem:[#allocation2 + $0x38] sm:$0xff] %v1726_v45 }
 0x4a3   :  { %v1590_v33 = vpop.f32.mrf.mxu1 }
 0x4a4   :  { %1605 = vst [vmem:[#allocation2 + $0x30] sm:$0xff] %v1590_v33 }
 0x4a5   :  { %1863 = shalt.err (!%p1860_p4)
}
 0x4a6   :  { %s1891_s6 = smov 128   ;;  %s1892_s7 = smov 8  }
 0x4a7   :  { %1618 = dma.vmem_to_hbm [thread:$0]  %s1613_s30, 1024, %s3178_s4, [#allocation3], %s1891_s6, %s1891_s6, %s1892_s7  }
 0x4a8   :  { %1872 = dma.done.wait [#allocation3], 1024  }
 0x4a9   :  { %1873 = vsyncadd [#allocation3], 4294966272 }
 0x4aa   :  { %1622 = vsyncpa [#allocation3], 1 }

</bundles_post_ra>
